<compile_context>
chip_gen: v7x
topology: tpu7x:2x2x1
jax: 0.10.0
libtpu: 0.0.40
codegen_flags: <defaults>
</compile_context>

<pallas_src>
import functools
import math

import jax
import jax.numpy as jnp
from jax.experimental import pallas as pl
from jax.experimental.pallas import tpu as pltpu


IMG_SIZE_TO_LAYER = {2: 7, 4: 6, 8: 5, 16: 4, 32: 3, 64: 2, 128: 1, 256: 0}
_LAYER_PLANES = [(32, 64), (64, 128), (128, 256), (256, 400),
                 (400, 400), (400, 400), (400, 400)]
_RGB_OUT = [32, 64, 128, 256, 400, 400, 400, 400]
LATENT_GEO_DIM = 256
LATENT_APP_DIM = 256


# --------------------------------------------------------------------------
# Fused Pallas conv kernel: conv (+fused AddCoords) + bias (+LeakyReLU)
# (+residual add & scale).  Operates on zero-padded NHWC input, stride 1.
# --------------------------------------------------------------------------
@functools.lru_cache(maxsize=None)
def _build_conv_call(B, Hp, Wp, Cin, Cout, Kh, Kw, pad, use_coords,
                     neg_slope, has_res, res_scale, dtype_name):
    dtype = jnp.dtype(dtype_name)
    Ho = Hp - Kh + 1
    Wo = Wp - Kw + 1
    H_in = Hp - 2 * pad
    W_in = Wp - 2 * pad

    def kernel(*refs):
        x_ref, w_ref, b_ref = refs[0], refs[1], refs[2]
        i = 3
        wc_ref = None
        if use_coords:
            wc_ref = refs[i]
            i += 1
        res_ref = None
        if has_res:
            res_ref = refs[i]
            i += 1
        o_ref = refs[i]

        bias = b_ref[...]  # (1, Cout)

        # Per-kw column coordinate vectors for the fused AddCoords (batch- and
        # row-invariant; zero inside the conv's zero-padding ring).
        col_mask = []
        yy_col = []
        if use_coords:
            c0 = jax.lax.broadcasted_iota(jnp.int32, (Wo, 1), 0)
            for kw in range(Kw):
                c = c0 + kw
                inside = (c >= pad) & (c < W_in + pad)
                col_mask.append(jnp.where(inside, 1.0, 0.0).astype(jnp.float32))
                yy = (c - pad).astype(jnp.float32) * (2.0 / (W_in - 1)) - 1.0
                yy_col.append(jnp.where(inside, yy, 0.0).astype(jnp.float32))

        for oh in range(Ho):
            acc = jnp.zeros((Wo, Cout), jnp.float32)
            for kh in range(Kh):
                r = oh + kh  # row in the padded input
                if r < pad or r >= H_in + pad:
                    continue  # entire row is zero padding -> contributes nothing
                if use_coords:
                    # xx coordinate is constant along an output row.
                    xval = (r - pad) * (2.0 / (H_in - 1)) - 1.0
                for kw in range(Kw):
                    xt = x_ref[0, r, kw:kw + Wo, :]            # (Wo, Cin)
                    acc = acc + jnp.dot(
                        xt, w_ref[kh, kw],
                        preferred_element_type=jnp.float32,
                        precision=jax.lax.Precision.HIGHEST)
                    if use_coords:
                        wc = wc_ref[kh, kw]                    # (2, Cout)
                        acc = acc + (col_mask[kw] * xval) * wc[0:1, :] \
                                  + yy_col[kw] * wc[1:2, :]
            acc = acc + bias
            if neg_slope is not None:
                acc = jnp.where(acc >= 0, acc, acc * neg_slope)
            if has_res:
                acc = (acc + res_ref[0, oh]) * res_scale
            o_ref[0, oh] = acc.astype(o_ref.dtype)             # lane-dense store

    in_specs = [
        pl.BlockSpec((1, Hp, Wp, Cin), lambda b_: (b_, 0, 0, 0)),
        pl.BlockSpec((Kh, Kw, Cin, Cout), lambda b_: (0, 0, 0, 0)),
        pl.BlockSpec((1, Cout), lambda b_: (0, 0)),
    ]
    if use_coords:
        in_specs.append(pl.BlockSpec((Kh, Kw, 2, Cout), lambda b_: (0, 0, 0, 0)))
    if has_res:
        in_specs.append(pl.BlockSpec((1, Ho, Wo, Cout), lambda b_: (b_, 0, 0, 0)))

    return pl.pallas_call(
        kernel,
        out_shape=jax.ShapeDtypeStruct((B, Ho, Wo, Cout), dtype),
        grid=(B,),
        in_specs=in_specs,
        out_specs=pl.BlockSpec((1, Ho, Wo, Cout), lambda b_: (b_, 0, 0, 0)),
        compiler_params=pltpu.CompilerParams(dimension_semantics=("parallel",)),
    )


def conv2d(x, w, b, *, stride=1, padding=0, coord=False, neg_slope=None,
           residual=None, res_scale=1.0):
    """Fused NHWC conv.  x: (B,H,W,Cin); w: (Kh,Kw,Cin(+2 if coord),Cout); b: (Cout,)."""
    B, H, W, Cin = x.shape
    Kh, Kw, Cin_tot, Cout = w.shape
    assert Cin_tot == Cin + (2 if coord else 0), (Cin_tot, Cin, coord)

    if Kh == 1 and Kw == 1 and stride > 1:
        # 1x1 strided conv == 1x1 conv on the subsampled input.
        x = x[:, ::stride, ::stride, :]
        B, H, W, Cin = x.shape
        stride = 1
    assert residual is None or stride == 1

    if padding:
        x = jnp.pad(x, ((0, 0), (padding, padding), (padding, padding), (0, 0)))
    Hp, Wp = H + 2 * padding, W + 2 * padding

    inputs = [x, w[:, :, :Cin, :], b.reshape(1, Cout)]
    if coord:
        inputs.append(w[:, :, Cin:, :])
    if residual is not None:
        inputs.append(residual)

    call = _build_conv_call(B, Hp, Wp, Cin, Cout, Kh, Kw, padding, coord,
                            neg_slope, residual is not None, float(res_scale),
                            jnp.dtype(x.dtype).name)
    out = call(*inputs)

    if stride > 1:
        # TODO(synk): fold the strided subsampling into the kernel's store
        # instead of computing the stride-1 output and slicing it here.
        out = out[:, ::stride, ::stride, :]
    return out


# --------------------------------------------------------------------------
# Parameters (PyTorch-shaped OIHW weights + channels-last HWIO copies)
# --------------------------------------------------------------------------
def _conv_param(key, cout, cin, kh, kw):
    kw_key, kb_key = jax.random.split(key)
    fan_in = cin * kh * kw
    std = math.sqrt(2.0 / (1.0 + 0.2 ** 2) / fan_in)   # kaiming_leaky_init(a=0.2)
    w = jax.random.normal(kw_key, (cout, cin, kh, kw), jnp.float32) * std
    b = jax.random.normal(kb_key, (cout,), jnp.float32) * 0.01
    return {"w_oihw": w, "w": jnp.transpose(w, (2, 3, 1, 0)), "b": b}


def init_params(key, start, input_dim):
    keys = iter(jax.random.split(key, 32))
    params = {"fromRGB": {}, "layers": {}}
    for idx in range(start, min(start + 2, 8)):
        params["fromRGB"][idx] = _conv_param(next(keys), _RGB_OUT[idx], input_dim, 1, 1)
    for li in range(start, 7):
        cin_l, cout_l = _LAYER_PLANES[li]
        params["layers"][li] = {
            "cc1": _conv_param(next(keys), cout_l, cin_l + 2, 3, 3),
            "cc2": _conv_param(next(keys), cout_l, cout_l + 2, 3, 3),
            "proj": _conv_param(next(keys), cout_l, cin_l, 1, 1),
        }
    out_dim = 1 + LATENT_GEO_DIM + LATENT_APP_DIM + 2
    params["final"] = _conv_param(next(keys), out_dim, 400, 2, 2)
    return params


# --------------------------------------------------------------------------
# Full forward pass (Pallas kernels + thin jnp glue)
# --------------------------------------------------------------------------
def ccs_forward_pallas(params, img_nchw, alpha, start):
    # TODO(synk): optional instance_noise injection (off by default) not implemented.
    img = jnp.transpose(img_nchw, (0, 2, 3, 1))  # NHWC, channels-last (lane-dense)

    p = params["fromRGB"][start]
    x = conv2d(img, p["w"], p["b"], neg_slope=0.2)

    for i, li in enumerate(range(start, 7)):
        if i == 1 and alpha < 1:
            p2 = params["fromRGB"][start + 1]
            skip = conv2d(img[:, ::2, ::2, :], p2["w"], p2["b"], neg_slope=0.2)
            x = alpha * x + (1.0 - alpha) * skip
        blk = params["layers"][li]
        # ResidualCCBlock: CoordConv(3x3) + LReLU, CoordConv(3x3, s2) + LReLU,
        # proj(1x1, s2) fused with the residual add and the 1/sqrt(2) scale.
        y = conv2d(x, blk["cc1"]["w"], blk["cc1"]["b"],
                   padding=1, coord=True, neg_slope=0.2)
        y = conv2d(y, blk["cc2"]["w"], blk["cc2"]["b"],
                   stride=2, padding=1, coord=True, neg_slope=0.2)
        x = conv2d(x, blk["proj"]["w"], blk["proj"]["b"], stride=2,
                   residual=y, res_scale=1.0 / math.sqrt(2.0))

    pf = params["final"]
    x = conv2d(x, pf["w"], pf["b"])          # (B, 1, 1, 515)
    flat = x.reshape(x.shape[0], -1)
    g, a = LATENT_GEO_DIM, LATENT_APP_DIM
    prediction = flat[:, 0:1]
    latent_geo = flat[:, 1:1 + g]
    latent_app = flat[:, 1 + g:1 + g + a]
    position = flat[:, 1 + g + a:1 + g + a + 2]
    return prediction, latent_geo, latent_app, position


# --------------------------------------------------------------------------
# Pure-JAX reference mirroring the PyTorch module (NCHW), for verification.
# --------------------------------------------------------------------------
def _ref_conv(x, w, b, stride=1, padding=0):
    out = jax.lax.conv_general_dilated(
        x, w, (stride, stride), [(padding, padding), (padding, padding)],
        dimension_numbers=("NCHW", "OIHW", "NCHW"),
        precision=jax.lax.Precision.HIGHEST)
    return out + b[None, :, None, None]


def _ref_lrelu(x):
    return jnp.where(x >= 0, x, 0.2 * x)


def _ref_addcoords(x):
    B, _, H, W = x.shape
    xx = (jnp.arange(H, dtype=jnp.float32) / (H - 1)) * 2.0 - 1.0
    yy = (jnp.arange(W, dtype=jnp.float32) / (W - 1)) * 2.0 - 1.0
    xx_c = jnp.broadcast_to(xx[None, None, :, None], (B, 1, H, W)).astype(x.dtype)
    yy_c = jnp.broadcast_to(yy[None, None, None, :], (B, 1, H, W)).astype(x.dtype)
    return jnp.concatenate([x, xx_c, yy_c], axis=1)


def ccs_forward_reference(params, img, alpha, start):
    p = params["fromRGB"][start]
    x = _ref_lrelu(_ref_conv(img, p["w_oihw"], p["b"]))
    for i, li in enumerate(range(start, 7)):
        if i == 1 and alpha < 1:
            p2 = params["fromRGB"][start + 1]
            skip = _ref_lrelu(_ref_conv(img[:, :, ::2, ::2], p2["w_oihw"], p2["b"]))
            x = alpha * x + (1.0 - alpha) * skip
        blk = params["layers"][li]
        y = _ref_lrelu(_ref_conv(_ref_addcoords(x), blk["cc1"]["w_oihw"], blk["cc1"]["b"], 1, 1))
        y = _ref_lrelu(_ref_conv(_ref_addcoords(y), blk["cc2"]["w_oihw"], blk["cc2"]["b"], 2, 1))
        ident = _ref_conv(x, blk["proj"]["w_oihw"], blk["proj"]["b"], 2, 0)
        x = (y + ident) / math.sqrt(2.0)
    pf = params["final"]
    x = _ref_conv(x, pf["w_oihw"], pf["b"])
    flat = x.reshape(x.shape[0], -1)
    g, a = LATENT_GEO_DIM, LATENT_APP_DIM
    return (flat[:, 0:1], flat[:, 1:1 + g],
            flat[:, 1 + g:1 + g + a], flat[:, 1 + g + a:1 + g + a + 2])


if __name__ == "__main__":
    key = jax.random.PRNGKey(0)
    k_img, k_par = jax.random.split(key)

    batch, input_dim, img_size = 2, 3, 8
    start = IMG_SIZE_TO_LAYER[img_size]  # -> 5: two ResidualCCBlocks are exercised
    img = jax.random.normal(k_img, (batch, input_dim, img_size, img_size), jnp.float32)
    params = init_params(k_par, start, input_dim)

    names = ("prediction", "latent_geo", "latent_app", "position")
    expected = {"prediction": (batch, 1), "latent_geo": (batch, LATENT_GEO_DIM),
                "latent_app": (batch, LATENT_APP_DIM), "position": (batch, 2)}

    for alpha in (1.0, 0.5):  # alpha < 1 exercises the fade-in fromRGB branch
        outs = jax.block_until_ready(ccs_forward_pallas(params, img, alpha, start))
        refs = ccs_forward_reference(params, img, alpha, start)
        for name, o, r in zip(names, outs, refs):
            assert o.shape == expected[name], (name, o.shape)
            assert jnp.allclose(o, r, rtol=5e-3, atol=5e-3), (
                name, alpha, float(jnp.max(jnp.abs(o - r))))

    print("KERNEL_OK")
</pallas_src>

<mosaic_0001>
module attributes {stable_mosaic.version = 11 : i64} {
  func.func @kernel(%arg0: i32, %arg1: memref<1x8x8x3xf32, #tpu.memory_space<vmem>>, %arg2: memref<1x1x3x400xf32, #tpu.memory_space<vmem>>, %arg3: memref<1x400xf32, #tpu.memory_space<vmem>>, %arg4: memref<1x8x8x400xf32, #tpu.memory_space<vmem>>) attributes {dimension_semantics = [#tpu.dimension_semantics<parallel>], iteration_bounds = array<i64: 2>, scalar_prefetch = 0 : i64, scratch_operands = 0 : i64, tpu.core_type = #tpu.core_type<tc>, window_params = [{transform_indices = @transform_0, window_bounds = array<i64: 1, 8, 8, 3>}, {pipeline_mode = #tpu.pipeline_mode<synchronous>, transform_indices = @transform_1, window_bounds = array<i64: 1, 1, 3, 400>}, {pipeline_mode = #tpu.pipeline_mode<synchronous>, transform_indices = @transform_2, window_bounds = array<i64: 1, 400>}, {transform_indices = @transform_3, window_bounds = array<i64: 1, 8, 8, 400>}]} {
    %c0 = arith.constant 0 : index
    %c0_0 = arith.constant 0 : index
    %0 = vector.load %arg3[%c0, %c0_0] : memref<1x400xf32, #tpu.memory_space<vmem>>, vector<1x400xf32>
    %cst = arith.constant 0.000000e+00 : f32
    %1 = vector.broadcast %cst : f32 to vector<8x400xf32>
    %c0_1 = arith.constant 0 : index
    %c0_2 = arith.constant 0 : index
    %c0_3 = arith.constant 0 : index
    %c0_4 = arith.constant 0 : index
    %2 = vector.load %arg1[%c0_1, %c0_2, %c0_3, %c0_4] : memref<1x8x8x3xf32, #tpu.memory_space<vmem>>, vector<1x1x8x3xf32>
    %3 = vector.shape_cast %2 : vector<1x1x8x3xf32> to vector<8x3xf32>
    %c0_5 = arith.constant 0 : index
    %c0_6 = arith.constant 0 : index
    %c0_7 = arith.constant 0 : index
    %c0_8 = arith.constant 0 : index
    %4 = vector.load %arg2[%c0_5, %c0_6, %c0_7, %c0_8] : memref<1x1x3x400xf32, #tpu.memory_space<vmem>>, vector<1x1x3x400xf32>
    %5 = vector.shape_cast %4 : vector<1x1x3x400xf32> to vector<3x400xf32>
    %cst_9 = arith.constant dense<0.000000e+00> : vector<8x400xf32>
    %6 = tpu.matmul %3, %5, %cst_9 {dimension_numbers = #tpu.dot_dimension_numbers<[1], [0], [0], [1], [0, 0, 1, 1], [], []>, precision = #tpu.contract_precision<fp32>} : vector<8x3xf32>, vector<3x400xf32>, vector<8x400xf32> -> vector<8x400xf32>
    %7 = arith.addf %1, %6 : vector<8x400xf32>
    %8 = vector.broadcast %0 : vector<1x400xf32> to vector<8x400xf32>
    %9 = arith.addf %7, %8 : vector<8x400xf32>
    %cst_10 = arith.constant 0.000000e+00 : f32
    %10 = vector.broadcast %cst_10 : f32 to vector<8x400xf32>
    %11 = arith.cmpf oge, %9, %10 : vector<8x400xf32>
    %cst_11 = arith.constant 2.000000e-01 : f32
    %12 = vector.broadcast %cst_11 : f32 to vector<8x400xf32>
    %13 = arith.mulf %9, %12 : vector<8x400xf32>
    %14 = arith.select %11, %9, %13 : vector<8x400xi1>, vector<8x400xf32>
    %c0_12 = arith.constant 0 : index
    %c0_13 = arith.constant 0 : index
    %c0_14 = arith.constant 0 : index
    %c0_15 = arith.constant 0 : index
    %15 = vector.load %arg4[%c0_12, %c0_13, %c0_14, %c0_15] : memref<1x8x8x400xf32, #tpu.memory_space<vmem>>, vector<1x1x8x400xf32>
    %16 = vector.shape_cast %15 : vector<1x1x8x400xf32> to vector<8x400xf32>
    %17 = vector.shape_cast %14 : vector<8x400xf32> to vector<1x1x8x400xf32>
    tpu.vector_store %arg4[%c0_12, %c0_13, %c0_14, %c0_15], %17 {strides = array<i32>} : memref<1x8x8x400xf32, #tpu.memory_space<vmem>>, vector<1x1x8x400xf32>,
    %cst_16 = arith.constant 0.000000e+00 : f32
    %18 = vector.broadcast %cst_16 : f32 to vector<8x400xf32>
    %c0_17 = arith.constant 0 : index
    %c1 = arith.constant 1 : index
    %c0_18 = arith.constant 0 : index
    %c0_19 = arith.constant 0 : index
    %19 = vector.load %arg1[%c0_17, %c1, %c0_18, %c0_19] : memref<1x8x8x3xf32, #tpu.memory_space<vmem>>, vector<1x1x8x3xf32>
    %20 = vector.shape_cast %19 : vector<1x1x8x3xf32> to vector<8x3xf32>
    %c0_20 = arith.constant 0 : index
    %c0_21 = arith.constant 0 : index
    %c0_22 = arith.constant 0 : index
    %c0_23 = arith.constant 0 : index
    %21 = vector.load %arg2[%c0_20, %c0_21, %c0_22, %c0_23] : memref<1x1x3x400xf32, #tpu.memory_space<vmem>>, vector<1x1x3x400xf32>
    %22 = vector.shape_cast %21 : vector<1x1x3x400xf32> to vector<3x400xf32>
    %cst_24 = arith.constant dense<0.000000e+00> : vector<8x400xf32>
    %23 = tpu.matmul %20, %22, %cst_24 {dimension_numbers = #tpu.dot_dimension_numbers<[1], [0], [0], [1], [0, 0, 1, 1], [], []>, precision = #tpu.contract_precision<fp32>} : vector<8x3xf32>, vector<3x400xf32>, vector<8x400xf32> -> vector<8x400xf32>
    %24 = arith.addf %18, %23 : vector<8x400xf32>
    %25 = vector.broadcast %0 : vector<1x400xf32> to vector<8x400xf32>
    %26 = arith.addf %24, %25 : vector<8x400xf32>
    %cst_25 = arith.constant 0.000000e+00 : f32
    %27 = vector.broadcast %cst_25 : f32 to vector<8x400xf32>
    %28 = arith.cmpf oge, %26, %27 : vector<8x400xf32>
    %cst_26 = arith.constant 2.000000e-01 : f32
    %29 = vector.broadcast %cst_26 : f32 to vector<8x400xf32>
    %30 = arith.mulf %26, %29 : vector<8x400xf32>
    %31 = arith.select %28, %26, %30 : vector<8x400xi1>, vector<8x400xf32>
    %c0_27 = arith.constant 0 : index
    %c1_28 = arith.constant 1 : index
    %c0_29 = arith.constant 0 : index
    %c0_30 = arith.constant 0 : index
    %32 = vector.load %arg4[%c0_27, %c1_28, %c0_29, %c0_30] : memref<1x8x8x400xf32, #tpu.memory_space<vmem>>, vector<1x1x8x400xf32>
    %33 = vector.shape_cast %32 : vector<1x1x8x400xf32> to vector<8x400xf32>
    %34 = vector.shape_cast %31 : vector<8x400xf32> to vector<1x1x8x400xf32>
    tpu.vector_store %arg4[%c0_27, %c1_28, %c0_29, %c0_30], %34 {strides = array<i32>} : memref<1x8x8x400xf32, #tpu.memory_space<vmem>>, vector<1x1x8x400xf32>,
    %cst_31 = arith.constant 0.000000e+00 : f32
    %35 = vector.broadcast %cst_31 : f32 to vector<8x400xf32>
    %c0_32 = arith.constant 0 : index
    %c2 = arith.constant 2 : index
    %c0_33 = arith.constant 0 : index
    %c0_34 = arith.constant 0 : index
    %36 = vector.load %arg1[%c0_32, %c2, %c0_33, %c0_34] : memref<1x8x8x3xf32, #tpu.memory_space<vmem>>, vector<1x1x8x3xf32>
    %37 = vector.shape_cast %36 : vector<1x1x8x3xf32> to vector<8x3xf32>
    %c0_35 = arith.constant 0 : index
    %c0_36 = arith.constant 0 : index
    %c0_37 = arith.constant 0 : index
    %c0_38 = arith.constant 0 : index
    %38 = vector.load %arg2[%c0_35, %c0_36, %c0_37, %c0_38] : memref<1x1x3x400xf32, #tpu.memory_space<vmem>>, vector<1x1x3x400xf32>
    %39 = vector.shape_cast %38 : vector<1x1x3x400xf32> to vector<3x400xf32>
    %cst_39 = arith.constant dense<0.000000e+00> : vector<8x400xf32>
    %40 = tpu.matmul %37, %39, %cst_39 {dimension_numbers = #tpu.dot_dimension_numbers<[1], [0], [0], [1], [0, 0, 1, 1], [], []>, precision = #tpu.contract_precision<fp32>} : vector<8x3xf32>, vector<3x400xf32>, vector<8x400xf32> -> vector<8x400xf32>
    %41 = arith.addf %35, %40 : vector<8x400xf32>
    %42 = vector.broadcast %0 : vector<1x400xf32> to vector<8x400xf32>
    %43 = arith.addf %41, %42 : vector<8x400xf32>
    %cst_40 = arith.constant 0.000000e+00 : f32
    %44 = vector.broadcast %cst_40 : f32 to vector<8x400xf32>
    %45 = arith.cmpf oge, %43, %44 : vector<8x400xf32>
    %cst_41 = arith.constant 2.000000e-01 : f32
    %46 = vector.broadcast %cst_41 : f32 to vector<8x400xf32>
    %47 = arith.mulf %43, %46 : vector<8x400xf32>
    %48 = arith.select %45, %43, %47 : vector<8x400xi1>, vector<8x400xf32>
    %c0_42 = arith.constant 0 : index
    %c2_43 = arith.constant 2 : index
    %c0_44 = arith.constant 0 : index
    %c0_45 = arith.constant 0 : index
    %49 = vector.load %arg4[%c0_42, %c2_43, %c0_44, %c0_45] : memref<1x8x8x400xf32, #tpu.memory_space<vmem>>, vector<1x1x8x400xf32>
    %50 = vector.shape_cast %49 : vector<1x1x8x400xf32> to vector<8x400xf32>
    %51 = vector.shape_cast %48 : vector<8x400xf32> to vector<1x1x8x400xf32>
    tpu.vector_store %arg4[%c0_42, %c2_43, %c0_44, %c0_45], %51 {strides = array<i32>} : memref<1x8x8x400xf32, #tpu.memory_space<vmem>>, vector<1x1x8x400xf32>,
    %cst_46 = arith.constant 0.000000e+00 : f32
    %52 = vector.broadcast %cst_46 : f32 to vector<8x400xf32>
    %c0_47 = arith.constant 0 : index
    %c3 = arith.constant 3 : index
    %c0_48 = arith.constant 0 : index
    %c0_49 = arith.constant 0 : index
    %53 = vector.load %arg1[%c0_47, %c3, %c0_48, %c0_49] : memref<1x8x8x3xf32, #tpu.memory_space<vmem>>, vector<1x1x8x3xf32>
    %54 = vector.shape_cast %53 : vector<1x1x8x3xf32> to vector<8x3xf32>
    %c0_50 = arith.constant 0 : index
    %c0_51 = arith.constant 0 : index
    %c0_52 = arith.constant 0 : index
    %c0_53 = arith.constant 0 : index
    %55 = vector.load %arg2[%c0_50, %c0_51, %c0_52, %c0_53] : memref<1x1x3x400xf32, #tpu.memory_space<vmem>>, vector<1x1x3x400xf32>
    %56 = vector.shape_cast %55 : vector<1x1x3x400xf32> to vector<3x400xf32>
    %cst_54 = arith.constant dense<0.000000e+00> : vector<8x400xf32>
    %57 = tpu.matmul %54, %56, %cst_54 {dimension_numbers = #tpu.dot_dimension_numbers<[1], [0], [0], [1], [0, 0, 1, 1], [], []>, precision = #tpu.contract_precision<fp32>} : vector<8x3xf32>, vector<3x400xf32>, vector<8x400xf32> -> vector<8x400xf32>
    %58 = arith.addf %52, %57 : vector<8x400xf32>
    %59 = vector.broadcast %0 : vector<1x400xf32> to vector<8x400xf32>
    %60 = arith.addf %58, %59 : vector<8x400xf32>
    %cst_55 = arith.constant 0.000000e+00 : f32
    %61 = vector.broadcast %cst_55 : f32 to vector<8x400xf32>
    %62 = arith.cmpf oge, %60, %61 : vector<8x400xf32>
    %cst_56 = arith.constant 2.000000e-01 : f32
    %63 = vector.broadcast %cst_56 : f32 to vector<8x400xf32>
    %64 = arith.mulf %60, %63 : vector<8x400xf32>
    %65 = arith.select %62, %60, %64 : vector<8x400xi1>, vector<8x400xf32>
    %c0_57 = arith.constant 0 : index
    %c3_58 = arith.constant 3 : index
    %c0_59 = arith.constant 0 : index
    %c0_60 = arith.constant 0 : index
    %66 = vector.load %arg4[%c0_57, %c3_58, %c0_59, %c0_60] : memref<1x8x8x400xf32, #tpu.memory_space<vmem>>, vector<1x1x8x400xf32>
    %67 = vector.shape_cast %66 : vector<1x1x8x400xf32> to vector<8x400xf32>
    %68 = vector.shape_cast %65 : vector<8x400xf32> to vector<1x1x8x400xf32>
    tpu.vector_store %arg4[%c0_57, %c3_58, %c0_59, %c0_60], %68 {strides = array<i32>} : memref<1x8x8x400xf32, #tpu.memory_space<vmem>>, vector<1x1x8x400xf32>,
    %cst_61 = arith.constant 0.000000e+00 : f32
    %69 = vector.broadcast %cst_61 : f32 to vector<8x400xf32>
    %c0_62 = arith.constant 0 : index
    %c4 = arith.constant 4 : index
    %c0_63 = arith.constant 0 : index
    %c0_64 = arith.constant 0 : index
    %70 = vector.load %arg1[%c0_62, %c4, %c0_63, %c0_64] : memref<1x8x8x3xf32, #tpu.memory_space<vmem>>, vector<1x1x8x3xf32>
    %71 = vector.shape_cast %70 : vector<1x1x8x3xf32> to vector<8x3xf32>
    %c0_65 = arith.constant 0 : index
    %c0_66 = arith.constant 0 : index
    %c0_67 = arith.constant 0 : index
    %c0_68 = arith.constant 0 : index
    %72 = vector.load %arg2[%c0_65, %c0_66, %c0_67, %c0_68] : memref<1x1x3x400xf32, #tpu.memory_space<vmem>>, vector<1x1x3x400xf32>
    %73 = vector.shape_cast %72 : vector<1x1x3x400xf32> to vector<3x400xf32>
    %cst_69 = arith.constant dense<0.000000e+00> : vector<8x400xf32>
    %74 = tpu.matmul %71, %73, %cst_69 {dimension_numbers = #tpu.dot_dimension_numbers<[1], [0], [0], [1], [0, 0, 1, 1], [], []>, precision = #tpu.contract_precision<fp32>} : vector<8x3xf32>, vector<3x400xf32>, vector<8x400xf32> -> vector<8x400xf32>
    %75 = arith.addf %69, %74 : vector<8x400xf32>
    %76 = vector.broadcast %0 : vector<1x400xf32> to vector<8x400xf32>
    %77 = arith.addf %75, %76 : vector<8x400xf32>
    %cst_70 = arith.constant 0.000000e+00 : f32
    %78 = vector.broadcast %cst_70 : f32 to vector<8x400xf32>
    %79 = arith.cmpf oge, %77, %78 : vector<8x400xf32>
    %cst_71 = arith.constant 2.000000e-01 : f32
    %80 = vector.broadcast %cst_71 : f32 to vector<8x400xf32>
    %81 = arith.mulf %77, %80 : vector<8x400xf32>
    %82 = arith.select %79, %77, %81 : vector<8x400xi1>, vector<8x400xf32>
    %c0_72 = arith.constant 0 : index
    %c4_73 = arith.constant 4 : index
    %c0_74 = arith.constant 0 : index
    %c0_75 = arith.constant 0 : index
    %83 = vector.load %arg4[%c0_72, %c4_73, %c0_74, %c0_75] : memref<1x8x8x400xf32, #tpu.memory_space<vmem>>, vector<1x1x8x400xf32>
    %84 = vector.shape_cast %83 : vector<1x1x8x400xf32> to vector<8x400xf32>
    %85 = vector.shape_cast %82 : vector<8x400xf32> to vector<1x1x8x400xf32>
    tpu.vector_store %arg4[%c0_72, %c4_73, %c0_74, %c0_75], %85 {strides = array<i32>} : memref<1x8x8x400xf32, #tpu.memory_space<vmem>>, vector<1x1x8x400xf32>,
    %cst_76 = arith.constant 0.000000e+00 : f32
    %86 = vector.broadcast %cst_76 : f32 to vector<8x400xf32>
    %c0_77 = arith.constant 0 : index
    %c5 = arith.constant 5 : index
    %c0_78 = arith.constant 0 : index
    %c0_79 = arith.constant 0 : index
    %87 = vector.load %arg1[%c0_77, %c5, %c0_78, %c0_79] : memref<1x8x8x3xf32, #tpu.memory_space<vmem>>, vector<1x1x8x3xf32>
    %88 = vector.shape_cast %87 : vector<1x1x8x3xf32> to vector<8x3xf32>
    %c0_80 = arith.constant 0 : index
    %c0_81 = arith.constant 0 : index
    %c0_82 = arith.constant 0 : index
    %c0_83 = arith.constant 0 : index
    %89 = vector.load %arg2[%c0_80, %c0_81, %c0_82, %c0_83] : memref<1x1x3x400xf32, #tpu.memory_space<vmem>>, vector<1x1x3x400xf32>
    %90 = vector.shape_cast %89 : vector<1x1x3x400xf32> to vector<3x400xf32>
    %cst_84 = arith.constant dense<0.000000e+00> : vector<8x400xf32>
    %91 = tpu.matmul %88, %90, %cst_84 {dimension_numbers = #tpu.dot_dimension_numbers<[1], [0], [0], [1], [0, 0, 1, 1], [], []>, precision = #tpu.contract_precision<fp32>} : vector<8x3xf32>, vector<3x400xf32>, vector<8x400xf32> -> vector<8x400xf32>
    %92 = arith.addf %86, %91 : vector<8x400xf32>
    %93 = vector.broadcast %0 : vector<1x400xf32> to vector<8x400xf32>
    %94 = arith.addf %92, %93 : vector<8x400xf32>
    %cst_85 = arith.constant 0.000000e+00 : f32
    %95 = vector.broadcast %cst_85 : f32 to vector<8x400xf32>
    %96 = arith.cmpf oge, %94, %95 : vector<8x400xf32>
    %cst_86 = arith.constant 2.000000e-01 : f32
    %97 = vector.broadcast %cst_86 : f32 to vector<8x400xf32>
    %98 = arith.mulf %94, %97 : vector<8x400xf32>
    %99 = arith.select %96, %94, %98 : vector<8x400xi1>, vector<8x400xf32>
    %c0_87 = arith.constant 0 : index
    %c5_88 = arith.constant 5 : index
    %c0_89 = arith.constant 0 : index
    %c0_90 = arith.constant 0 : index
    %100 = vector.load %arg4[%c0_87, %c5_88, %c0_89, %c0_90] : memref<1x8x8x400xf32, #tpu.memory_space<vmem>>, vector<1x1x8x400xf32>
    %101 = vector.shape_cast %100 : vector<1x1x8x400xf32> to vector<8x400xf32>
    %102 = vector.shape_cast %99 : vector<8x400xf32> to vector<1x1x8x400xf32>
    tpu.vector_store %arg4[%c0_87, %c5_88, %c0_89, %c0_90], %102 {strides = array<i32>} : memref<1x8x8x400xf32, #tpu.memory_space<vmem>>, vector<1x1x8x400xf32>,
    %cst_91 = arith.constant 0.000000e+00 : f32
    %103 = vector.broadcast %cst_91 : f32 to vector<8x400xf32>
    %c0_92 = arith.constant 0 : index
    %c6 = arith.constant 6 : index
    %c0_93 = arith.constant 0 : index
    %c0_94 = arith.constant 0 : index
    %104 = vector.load %arg1[%c0_92, %c6, %c0_93, %c0_94] : memref<1x8x8x3xf32, #tpu.memory_space<vmem>>, vector<1x1x8x3xf32>
    %105 = vector.shape_cast %104 : vector<1x1x8x3xf32> to vector<8x3xf32>
    %c0_95 = arith.constant 0 : index
    %c0_96 = arith.constant 0 : index
    %c0_97 = arith.constant 0 : index
    %c0_98 = arith.constant 0 : index
    %106 = vector.load %arg2[%c0_95, %c0_96, %c0_97, %c0_98] : memref<1x1x3x400xf32, #tpu.memory_space<vmem>>, vector<1x1x3x400xf32>
    %107 = vector.shape_cast %106 : vector<1x1x3x400xf32> to vector<3x400xf32>
    %cst_99 = arith.constant dense<0.000000e+00> : vector<8x400xf32>
    %108 = tpu.matmul %105, %107, %cst_99 {dimension_numbers = #tpu.dot_dimension_numbers<[1], [0], [0], [1], [0, 0, 1, 1], [], []>, precision = #tpu.contract_precision<fp32>} : vector<8x3xf32>, vector<3x400xf32>, vector<8x400xf32> -> vector<8x400xf32>
    %109 = arith.addf %103, %108 : vector<8x400xf32>
    %110 = vector.broadcast %0 : vector<1x400xf32> to vector<8x400xf32>
    %111 = arith.addf %109, %110 : vector<8x400xf32>
    %cst_100 = arith.constant 0.000000e+00 : f32
    %112 = vector.broadcast %cst_100 : f32 to vector<8x400xf32>
    %113 = arith.cmpf oge, %111, %112 : vector<8x400xf32>
    %cst_101 = arith.constant 2.000000e-01 : f32
    %114 = vector.broadcast %cst_101 : f32 to vector<8x400xf32>
    %115 = arith.mulf %111, %114 : vector<8x400xf32>
    %116 = arith.select %113, %111, %115 : vector<8x400xi1>, vector<8x400xf32>
    %c0_102 = arith.constant 0 : index
    %c6_103 = arith.constant 6 : index
    %c0_104 = arith.constant 0 : index
    %c0_105 = arith.constant 0 : index
    %117 = vector.load %arg4[%c0_102, %c6_103, %c0_104, %c0_105] : memref<1x8x8x400xf32, #tpu.memory_space<vmem>>, vector<1x1x8x400xf32>
    %118 = vector.shape_cast %117 : vector<1x1x8x400xf32> to vector<8x400xf32>
    %119 = vector.shape_cast %116 : vector<8x400xf32> to vector<1x1x8x400xf32>
    tpu.vector_store %arg4[%c0_102, %c6_103, %c0_104, %c0_105], %119 {strides = array<i32>} : memref<1x8x8x400xf32, #tpu.memory_space<vmem>>, vector<1x1x8x400xf32>,
    %cst_106 = arith.constant 0.000000e+00 : f32
    %120 = vector.broadcast %cst_106 : f32 to vector<8x400xf32>
    %c0_107 = arith.constant 0 : index
    %c7 = arith.constant 7 : index
    %c0_108 = arith.constant 0 : index
    %c0_109 = arith.constant 0 : index
    %121 = vector.load %arg1[%c0_107, %c7, %c0_108, %c0_109] : memref<1x8x8x3xf32, #tpu.memory_space<vmem>>, vector<1x1x8x3xf32>
    %122 = vector.shape_cast %121 : vector<1x1x8x3xf32> to vector<8x3xf32>
    %c0_110 = arith.constant 0 : index
    %c0_111 = arith.constant 0 : index
    %c0_112 = arith.constant 0 : index
    %c0_113 = arith.constant 0 : index
    %123 = vector.load %arg2[%c0_110, %c0_111, %c0_112, %c0_113] : memref<1x1x3x400xf32, #tpu.memory_space<vmem>>, vector<1x1x3x400xf32>
    %124 = vector.shape_cast %123 : vector<1x1x3x400xf32> to vector<3x400xf32>
    %cst_114 = arith.constant dense<0.000000e+00> : vector<8x400xf32>
    %125 = tpu.matmul %122, %124, %cst_114 {dimension_numbers = #tpu.dot_dimension_numbers<[1], [0], [0], [1], [0, 0, 1, 1], [], []>, precision = #tpu.contract_precision<fp32>} : vector<8x3xf32>, vector<3x400xf32>, vector<8x400xf32> -> vector<8x400xf32>
    %126 = arith.addf %120, %125 : vector<8x400xf32>
    %127 = vector.broadcast %0 : vector<1x400xf32> to vector<8x400xf32>
    %128 = arith.addf %126, %127 : vector<8x400xf32>
    %cst_115 = arith.constant 0.000000e+00 : f32
    %129 = vector.broadcast %cst_115 : f32 to vector<8x400xf32>
    %130 = arith.cmpf oge, %128, %129 : vector<8x400xf32>
    %cst_116 = arith.constant 2.000000e-01 : f32
    %131 = vector.broadcast %cst_116 : f32 to vector<8x400xf32>
    %132 = arith.mulf %128, %131 : vector<8x400xf32>
    %133 = arith.select %130, %128, %132 : vector<8x400xi1>, vector<8x400xf32>
    %c0_117 = arith.constant 0 : index
    %c7_118 = arith.constant 7 : index
    %c0_119 = arith.constant 0 : index
    %c0_120 = arith.constant 0 : index
    %134 = vector.load %arg4[%c0_117, %c7_118, %c0_119, %c0_120] : memref<1x8x8x400xf32, #tpu.memory_space<vmem>>, vector<1x1x8x400xf32>
    %135 = vector.shape_cast %134 : vector<1x1x8x400xf32> to vector<8x400xf32>
    %136 = vector.shape_cast %133 : vector<8x400xf32> to vector<1x1x8x400xf32>
    tpu.vector_store %arg4[%c0_117, %c7_118, %c0_119, %c0_120], %136 {strides = array<i32>} : memref<1x8x8x400xf32, #tpu.memory_space<vmem>>, vector<1x1x8x400xf32>,
    return
  }
  func.func @transform_0(%arg0: i32) -> (i32, i32, i32, i32) {
    %c0_i32 = arith.constant 0 : i32
    %c0_i32_0 = arith.constant 0 : i32
    %c0_i32_1 = arith.constant 0 : i32
    %c0_i32_2 = arith.constant 0 : i32
    return %arg0, %c0_i32, %c0_i32_0, %c0_i32_1 : i32, i32, i32, i32
  }
  func.func @transform_1(%arg0: i32) -> (i32, i32, i32, i32) {
    %c0_i32 = arith.constant 0 : i32
    %c0_i32_0 = arith.constant 0 : i32
    %c0_i32_1 = arith.constant 0 : i32
    %c0_i32_2 = arith.constant 0 : i32
    %c0_i32_3 = arith.constant 0 : i32
    return %c0_i32, %c0_i32_0, %c0_i32_1, %c0_i32_2 : i32, i32, i32, i32
  }
  func.func @transform_2(%arg0: i32) -> (i32, i32) {
    %c0_i32 = arith.constant 0 : i32
    %c0_i32_0 = arith.constant 0 : i32
    %c0_i32_1 = arith.constant 0 : i32
    return %c0_i32, %c0_i32_0 : i32, i32
  }
  func.func @transform_3(%arg0: i32) -> (i32, i32, i32, i32) {
    %c0_i32 = arith.constant 0 : i32
    %c0_i32_0 = arith.constant 0 : i32
    %c0_i32_1 = arith.constant 0 : i32
    %c0_i32_2 = arith.constant 0 : i32
    return %arg0, %c0_i32, %c0_i32_0, %c0_i32_1 : i32, i32, i32, i32
  }
}

</mosaic_0001>

<bundles_post_ra>
// kernel: tpu_custom_call.1
= control target key start
LH: loop header
LB: loop body
LE: loop exit
PB: predicated region body
PF: predicated region fallthrough
CT: control target
= control target key end

     0   :  { %8 = vsyncpa [#allocation3], 0  ;;  %s9274_s0 = inlined_call_operand.vmem [shape: f32[2,8,8,3], index: 0, kind: input, shape index: {}]   ;;  %s9275_s1 = inlined_call_operand.vmem [shape: f32[1,1,3,400], index: 1, kind: input, shape index: {}]   ;;  %s9276_s2 = inlined_call_operand.vmem [shape: f32[1,400], index: 2, kind: input, shape index: {}]   ;;  %s9277_s3 = inlined_call_operand.hbm [shape: f32[2,8,8,400], index: 3, kind: output, shape index: {}]  }
   0x1   :  { %10 = vsyncpa [#allocation3 + $0x1], 0  ;;  %s8383_s12 = smov 0   ;;  %s8385_s13 = smov 0  }
   0x2   :  { %s8387_s14 = smov 0   ;;  %s8389_s15 = smov 0  }
   0x3 LB: > { %s8404_s16 = sadd.s32 4294967295, %s8357_s15   ;;  %s7996_s17 = sadd.s32 4294967294, %s8357_s15   ;;  %s8357_s15 = sphi %s8389_s15, %s9283_s15   ;;  %s8353_s14 = sphi %s8387_s14, %s9282_s14   ;;  %s8349_s13 = sphi %s8385_s13, %s9281_s13   ;;  %s8345_s12 = sphi %s8383_s12, %s9280_s12  }
   0x4   : > { %s8408_s18 = sadd.s32 1, %s8357_s15   ;;  %s91_s19 = sadd.s32 1, %s8353_s14 }
   0x5   : > { %s88_s20 = ssub.s32 %s8357_s15, %s8408_s18  ;;  %p101_p0 = scmp.ne.s32.totalorder %s8353_s14, %s8349_s13 }
   0x6   : > { %p89_p1 = scmp.eq.s32.totalorder %s88_s20, 0  ;;  %p102_p2 = scmp.eq.s32.totalorder %s8404_s16, 1 }
   0x7   : > { %p107_p3 = scmp.ne.s32.totalorder %s8349_s13, %s8345_s12  ;;  %p108_p4 = scmp.eq.s32.totalorder %s7996_s17, 1 }
   0x8   : > { %s8419_s21 = scalar_select %p89_p1, %s8353_s14, %s91_s19  }
   0x9   : > { %p8421_p5 = por %p102_p2, %p101_p0  ;;  %p8425_p6 = por %p108_p4, %p107_p3 }
   0xa   : > { %p7999_p7 = scmp.ge.s32.totalorder %s8357_s15, 1  ;;  %p140_p8 = scmp.lt.s32.totalorder %s8357_s15, 3 }
   0xc   : > { %p141_p9 = pnand %p7999_p7, %p140_p8 }
   0xd   : > { %v171_v0 = vld [vmem:[%s9275_s1] sm:$0x77] (!%p141_p9)  ;;  %vm202_vm0 = vcmask (!%p141_p9), 1042432   ;;  %v172_v1 = vld [vmem:[%s9275_s1 + $0x8] sm:$0x77] (!%p141_p9)  ;;  %v8359_v6 = vmov (!%p141_p9), 0.0  }
   0xe   : > { %144 = sbr.rel (%p141_p9) target bundleno = 618 (0x26a), region = 32  ;;  %v196_v2 = vcombine.high (!%p141_p9), %v171_v0, %v171_v0  ;;  %v197_v3 = vcombine.high (!%p141_p9), %v172_v1, %v172_v1  ;;  %v203_v4 = vsel (!%p141_p9), %vm202_vm0, %v171_v0, 0  ;;  %v207_v5 = vsel (!%p141_p9), %vm202_vm0, %v172_v1, 0  ;;  %277 = vmatprep.mubr.f32.mxu0 (!%p141_p9), %v8359_v6  ;;  %742 = vmatprep.mubr.f32.mxu1 (!%p141_p9), %v8359_v6  ;;  %p164_p10 = scmp.lt.s32.totalorder (!%p141_p9), %s8404_s16, 1  ;;  %v1160_v36 = vld [vmem:[%s9275_s1] sm:$0x77] (!%p141_p9) }
   0xf   : > { %v8442_v7 = vand.u32 (!%p141_p9), 4294901760, %v203_v4  ;;  %v8444_v8 = vand.u32 (!%p141_p9), 4294901760, %v207_v5  ;;  %vm198_vm1 = vcmask (!%p141_p9), 23552   ;;  %v1161_v37 = vld [vmem:[%s9275_s1 + $0x8] sm:$0x77] (!%p141_p9)  ;;  %v1164_v38 = vcombine.high (!%p141_p9), %v1160_v36, %v1160_v36  ;;  %s161_s24 = sand.u32 (!%p141_p9), 1, %s8349_s13  }
  0x10   : > { %v205_v9 = vsel (!%p141_p9), %vm202_vm0, %v196_v2, 0  ;;  %v209_v10 = vsel (!%p141_p9), %vm202_vm0, %v197_v3, 0  ;;  %v1165_v39 = vcombine.high (!%p141_p9), %v1161_v37, %v1161_v37  ;;  %v1169_v45 = vsel (!%p141_p9), %vm202_vm0, %v1160_v36, 0  ;;  %s8968_s25 = sshll.u32 (!%p141_p9), %s161_s24, 8  ;;  %s9233_s8 = scalar_lea.sflag (!%p141_p9), [#allocation3], %s161_s24 }
  0x11   : > { %v8449_v11 = vand.u32 (!%p141_p9), 4294901760, %v205_v9  ;;  %v8451_v12 = vand.u32 (!%p141_p9), 4294901760, %v209_v10  ;;  %v8454_v13 = vsub.f32 (!%p141_p9), %v203_v4, %v8442_v7  ;;  %v8457_v14 = vsub.f32 (!%p141_p9), %v207_v5, %v8444_v8  ;;  %s8996_s26 = scalar_lea.vmem (!%p141_p9), [#allocation2], %s8968_s25  ;;  %s8360_s10 = smov (!%p141_p9), [#allocation2]  }
  0x12   : > { %v1171_v41 = vsel (!%p141_p9), %vm202_vm0, %v1164_v38, 0  ;;  %v1175_v42 = vsel (!%p141_p9), %vm202_vm0, %v1165_v39, 0  ;;  %v1173_v46 = vsel (!%p141_p9), %vm202_vm0, %v1161_v37, 0  ;;  %v8511_v49 = vand.u32 (!%p141_p9), 4294901760, %v1169_v45  ;;  %s7934_s4 = sshll.u32 (!%p141_p9), %s8996_s26, 4  ;;  %s8299_s11 = sshll.u32 (!%p141_p9), %s8360_s10, 4  ;;  %s9224_s4 = int_to_ptr.vmem [resolvable:$true] %s7934_s4  ;;  %s8300_s11 = int_to_ptr.vmem [resolvable:$false] %s8299_s11 }
  0x13   : > { %212 = vmatprep.subr.mxu0 (!%p141_p9), %v8449_v11  ;;  %677 = vmatprep.subr.mxu1 (!%p141_p9), %v8451_v12  ;;  %v290_v15 = vsub.f32 (!%p141_p9), %v205_v9, %v8449_v11  ;;  %v755_v16 = vsub.f32 (!%p141_p9), %v209_v10, %v8451_v12  ;;  %v297_v18 = vand.u32 (!%p141_p9), 4294901760, %v8454_v13  ;;  %v762_v22 = vand.u32 (!%p141_p9), 4294901760, %v8457_v14  ;;  %v2127_v9 = vld [vmem:[%s9275_s1 + $0x8] sm:$0x77] (!%p141_p9)  ;;  %s8295_s9 = scalar_lea.vmem (!%p141_p9), %s9224_s4, 4096  ;;  %s8301_s17 = scalar_lea.vmem (!%p141_p9), %s8300_s11, 8192 }
  0x14   : > { %214 = vmatpush1.msra.mxu0 (!%p141_p9), %v8442_v7  ;;  %679 = vmatpush1.msra.mxu1 (!%p141_p9), %v8444_v8  ;;  %v8503_v44 = vand.u32 (!%p141_p9), 4294901760, %v1171_v41  ;;  %v8507_v47 = vand.u32 (!%p141_p9), 4294901760, %v1175_v42  ;;  %v8513_v50 = vand.u32 (!%p141_p9), 4294901760, %v1173_v46  ;;  %v8527_v54 = vsub.f32 (!%p141_p9), %v1169_v45, %v8511_v49  ;;  %p8296_p11 = scmp.ne.s32.totalorder (!%p141_p9), %s9224_s4, %s8295_s9  ;;  %p8302_p0 = scmp.lt.s32.totalorder (!%p141_p9), %s9224_s4, %s8300_s11 }
  0x15   : > { %s165_s28 = scalar_select %p164_p10, %s8404_s16, 1  ;;  %v291_v19 = vand.u32 4294901760, %v290_v15  ;;  %v756_v20 = vand.u32 4294901760, %v755_v16  ;;  %v298_v29 = vsub.f32 %v8454_v13, %v297_v18  ;;  %v763_v30 = vsub.f32 %v8457_v14, %v762_v22 }
  0x16   : > { %v8518_v51 = vsub.f32 %v1171_v41, %v8503_v44  ;;  %v8523_v52 = vsub.f32 %v1175_v42, %v8507_v47  ;;  %v8530_v55 = vsub.f32 %v1173_v46, %v8513_v50  ;;  %v1263_v59 = vand.u32 4294901760, %v8527_v54  ;;  %p8297_p12 = pnand %p8296_p11, %p8421_p5  ;;  %p8303_p1 = scmp.lt.s32.totalorder %s8301_s17, %s8295_s9 }
  0x17   : > { %s8043_s29 = sshll.u32 %s165_s28, 6  ;;  %v292_v24 = vsub.f32 %v290_v15, %v291_v19  ;;  %v757_v25 = vsub.f32 %v755_v16, %v756_v20  ;;  %v299_v33 = vand.u32 4294901760, %v298_v29  ;;  %v764_v34 = vand.u32 4294901760, %v763_v30 }
  0x18   : > { %s8466_s5 = scalar_lea.vmem %s9274_s0, %s8043_s29  ;;  %v1257_v56 = vand.u32 4294901760, %v8518_v51  ;;  %v1722_v57 = vand.u32 4294901760, %v8523_v52  ;;  %v1728_v60 = vand.u32 4294901760, %v8530_v55  ;;  %v1264_v0 = vsub.f32 %v8527_v54, %v1263_v59  ;;  %p8298_p13 = pneg %p8297_p12 }
  0x19   : > { %v170_v17 = vld [vmem:[%s8466_s5] sm:$0xff]  ;;  %v293_v27 = vand.u32 4294901760, %v292_v24  ;;  %v758_v28 = vand.u32 4294901760, %v757_v25  ;;  %v8003_v40 = vld [vmem:[%s8466_s5 + $0x8] sm:$0xff]  ;;  %vm1156_vm2 = vcmask 130048   ;;  %p8304_p2 = por %p8303_p1, %p8302_p0 }
  0x1a   : > { %v200_v21 = vsel %vm198_vm1, %v170_v17, 0  ;;  %v1167_v43 = vsel %vm198_vm1, %v8003_v40, 0  ;;  %v1258_v61 = vsub.f32 %v8518_v51, %v1257_v56  ;;  %v1723_v62 = vsub.f32 %v8523_v52, %v1722_v57 }
  0x1b   : > { %v8474_v23 = vand.u32 4294901760, %v200_v21  ;;  %294 = vmatprep.subr.mxu0 %v293_v27  ;;  %759 = vmatprep.subr.mxu1 %v758_v28  ;;  %v8509_v48 = vand.u32 4294901760, %v1167_v43  ;;  %v1729_v1 = vsub.f32 %v8530_v55, %v1728_v60  ;;  %v1265_v5 = vand.u32 4294901760, %v1264_v0  ;;  %p8305_p3 = pnand %p8304_p2, %p8298_p13 }
  0x1c   : > { %v1259_v2 = vand.u32 4294901760, %v1258_v61  ;;  %v1724_v3 = vand.u32 4294901760, %v1723_v62 }
  0x1d   : > { %v279_v26 = vsub.f32 %v200_v21, %v8474_v23  ;;  %v1245_v53 = vsub.f32 %v1167_v43, %v8509_v48  ;;  %v3092_v43 = vld [vmem:[%s9275_s1] sm:$0x77] }
  0x1e   : > { %v3096_v45 = vcombine.high %v3092_v43, %v3092_v43 }
  0x1f   : > { %v280_v31 = vand.u32 4294901760, %v279_v26  ;;  %v8536_v58 = vand.u32 4294901760, %v1245_v53 }
  0x21   : > { %v281_v32 = vsub.f32 %v279_v26, %v280_v31  ;;  %v1247_v63 = vsub.f32 %v1245_v53, %v8536_v58 }
  0x23   : > { %v282_v35 = vand.u32 4294901760, %v281_v32  ;;  %v1248_v4 = vand.u32 4294901760, %v1247_v63 }
  0x25   : > { %283 = vmatmul.mubr.f32.vlgmr.msra.gmra.mrb[0].mxu0 %v282_v35  ;;  %748 = vmatmul.mubr.f32.vlgmr.msra.gmra.mrb[0].mxu1 %v282_v35 }
  0x26   : > { %300 = vmatpush1.msra.mxu0 %v299_v33  ;;  %765 = vmatpush1.msra.mxu1 %v764_v34 }
  0x27   : > { %363 = vmatprep.mubr.f32.mxu0 %v8359_v6  ;;  %373 = vmatprep.subr.mxu0 %v290_v15 }
  0x28   : > { %828 = vmatprep.mubr.f32.mxu1 %v8359_v6  ;;  %838 = vmatprep.subr.mxu1 %v755_v16 }
  0x2d   : > { %365 = vmatmul.mubr.f32.vlgmr.msra.gmra.mrb[0].mxu0 %v8474_v23  ;;  %830 = vmatmul.mubr.f32.vlgmr.msra.gmra.mrb[0].mxu1 %v8474_v23 }
  0x2e   : > { %376 = vmatpush1.msra.mxu0 %v8454_v13  ;;  %841 = vmatpush1.msra.mxu1 %v8457_v14 }
  0x2f   : > { %439 = vmatprep.mubr.f32.mxu0 %v8359_v6  ;;  %449 = vmatprep.subr.mxu0 %v8449_v11 }
  0x30   : > { %904 = vmatprep.mubr.f32.mxu1 %v8359_v6  ;;  %914 = vmatprep.subr.mxu1 %v8451_v12 }
  0x35   : > { %442 = vmatmul.mubr.f32.vlgmr.msra.gmra.mrb[0].mxu0 %v279_v26  ;;  %907 = vmatmul.mubr.f32.vlgmr.msra.gmra.mrb[0].mxu1 %v279_v26 }
  0x36   : > { %451 = vmatpush1.msra.mxu0 %v8442_v7  ;;  %916 = vmatpush1.msra.mxu1 %v8444_v8 }
  0x37   : > { %514 = vmatprep.mubr.f32.mxu0 %v8359_v6  ;;  %527 = vmatprep.subr.mxu0 %v291_v19 }
  0x38   : > { %979 = vmatprep.mubr.f32.mxu1 %v8359_v6  ;;  %992 = vmatprep.subr.mxu1 %v756_v20 }
  0x3d   : > { %518 = vmatmul.mubr.f32.vlgmr.msra.gmra.mrb[0].mxu0 %v280_v31  ;;  %983 = vmatmul.mubr.f32.vlgmr.msra.gmra.mrb[0].mxu1 %v280_v31 }
  0x3e   : > { %531 = vmatpush1.msra.mxu0 %v297_v18  ;;  %996 = vmatpush1.msra.mxu1 %v762_v22  ;;  %v2139_v18 = vsel %vm202_vm0, %v2127_v9, 0 }
  0x3f   : > { %594 = vmatprep.mubr.f32.mxu0 %v8359_v6  ;;  %603 = vmatprep.subr.mxu0 %v8449_v11  ;;  %v2131_v11 = vcombine.high %v2127_v9, %v2127_v9  ;;  %v8595_v22 = vand.u32 4294901760, %v2139_v18 }
  0x40   : > { %1059 = vmatprep.mubr.f32.mxu1 %v8359_v6  ;;  %1068 = vmatprep.subr.mxu1 %v8451_v12  ;;  %v8008_v12 = vld [vmem:[%s8466_s5 + $0x10] sm:$0xff] }
  0x41   : > { %v2141_v14 = vsel %vm202_vm0, %v2131_v11, 0  ;;  %v2133_v15 = vsel %vm198_vm1, %v8008_v12, 0  ;;  %v8612_v27 = vsub.f32 %v2139_v18, %v8595_v22 }
  0x42   : > { %v8587_v19 = vand.u32 4294901760, %v2141_v14  ;;  %v8591_v20 = vand.u32 4294901760, %v2133_v15 }
  0x43   : > { %v2694_v32 = vand.u32 4294901760, %v8612_v27 }
  0x44   : > { %v8605_v24 = vsub.f32 %v2141_v14, %v8587_v19  ;;  %v2211_v25 = vsub.f32 %v2133_v15, %v8591_v20  ;;  %v4058_v15 = vld [vmem:[%s9275_s1] sm:$0x77] }
  0x45   : > { %596 = vmatmul.mubr.f32.vlgmr.msra.gmra.mrb[0].mxu0 %v8474_v23  ;;  %1061 = vmatmul.mubr.f32.vlgmr.msra.gmra.mrb[0].mxu1 %v8474_v23  ;;  %v2695_v37 = vsub.f32 %v8612_v27, %v2694_v32 }
  0x46   : > { %605 = vmatpush1.msra.mxu0 %v8442_v7  ;;  %1070 = vmatpush1.msra.mxu1 %v8444_v8  ;;  %v1730_v7 = vand.u32 4294901760, %v1729_v1  ;;  %v2126_v8 = vld [vmem:[%s9275_s1] sm:$0x77]  ;;  %v2688_v29 = vand.u32 4294901760, %v8605_v24  ;;  %v8618_v30 = vand.u32 4294901760, %v2211_v25 }
  0x47   : > { %668 = vmatprep.mubr.f32.mxu0 %v8359_v6  ;;  %1133 = vmatprep.mubr.f32.mxu1 %v8359_v6  ;;  %v2130_v10 = vcombine.high %v2126_v8, %v2126_v8  ;;  %v2135_v17 = vsel %vm202_vm0, %v2126_v8, 0  ;;  %v2696_v42 = vand.u32 4294901760, %v2695_v37 }
  0x48   : > { %1178 = vmatprep.subr.mxu0 %v8503_v44  ;;  %1643 = vmatprep.subr.mxu1 %v8507_v47  ;;  %v8593_v21 = vand.u32 4294901760, %v2135_v17  ;;  %v2689_v34 = vsub.f32 %v8605_v24, %v2688_v29  ;;  %v2213_v35 = vsub.f32 %v2211_v25, %v8618_v30 }
  0x49   : > { %v2137_v13 = vsel %vm202_vm0, %v2130_v10, 0 }
  0x4a   : > { %v8583_v16 = vand.u32 4294901760, %v2137_v13  ;;  %v8609_v26 = vsub.f32 %v2135_v17, %v8593_v21  ;;  %v2690_v39 = vand.u32 4294901760, %v2689_v34  ;;  %v2214_v40 = vand.u32 4294901760, %v2213_v35 }
  0x4b   : > { %v4062_v17 = vcombine.high %v4058_v15, %v4058_v15 }
  0x4c   : > { %v2229_v31 = vand.u32 4294901760, %v8609_v26 }
  0x4d   : > { %670 = vmatmul.mubr.f32.vlgmr.msra.gmra.mrb[0].mxu0 %v8474_v23  ;;  %1135 = vmatmul.mubr.f32.vlgmr.msra.gmra.mrb[0].mxu1 %v8474_v23  ;;  %v8600_v23 = vsub.f32 %v2137_v13, %v8583_v16 }
  0x4e   : > { %1180 = vmatpush1.msra.mxu0 %v8511_v49  ;;  %1645 = vmatpush1.msra.mxu1 %v8513_v50  ;;  %v2230_v36 = vsub.f32 %v8609_v26, %v2229_v31 }
  0x4f   : > { %1243 = vmatprep.mubr.f32.mxu0 %v8359_v6  ;;  %1260 = vmatprep.subr.mxu0 %v1259_v2  ;;  %v2223_v28 = vand.u32 4294901760, %v8600_v23 }
  0x50   : > { %1708 = vmatprep.mubr.f32.mxu1 %v8359_v6  ;;  %1725 = vmatprep.subr.mxu1 %v1724_v3  ;;  %v2231_v41 = vand.u32 4294901760, %v2230_v36 }
  0x51   : > { %1249 = vmatmul.mubr.f32.vlgmr.msra.gmra.mrb[2].mxu0 %v1248_v4  ;;  %1714 = vmatmul.mubr.f32.vlgmr.msra.gmra.mrb[2].mxu1 %v1248_v4  ;;  %v2224_v33 = vsub.f32 %v8600_v23, %v2223_v28 }
  0x52   : > { %1266 = vmatpush1.msra.mxu0 %v1265_v5  ;;  %1731 = vmatpush1.msra.mxu1 %v1730_v7 }
  0x53   : > { %1329 = vmatprep.mubr.f32.mxu0 %v8359_v6  ;;  %1339 = vmatprep.subr.mxu0 %v8518_v51  ;;  %v2225_v38 = vand.u32 4294901760, %v2224_v33 }
  0x54   : > { %1794 = vmatprep.mubr.f32.mxu1 %v8359_v6  ;;  %1804 = vmatprep.subr.mxu1 %v8523_v52  ;;  %v3101_v52 = vsel %vm202_vm0, %v3092_v43, 0 }
  0x59   : > { %1331 = vmatmul.mubr.f32.vlgmr.msra.gmra.mrb[2].mxu0 %v8509_v48  ;;  %1796 = vmatmul.mubr.f32.vlgmr.msra.gmra.mrb[2].mxu1 %v8509_v48 }
  0x5a   : > { %1342 = vmatpush1.msra.mxu0 %v8527_v54  ;;  %1807 = vmatpush1.msra.mxu1 %v8530_v55 }
  0x5b   : > { %1405 = vmatprep.mubr.f32.mxu0 %v8359_v6  ;;  %1415 = vmatprep.subr.mxu0 %v8503_v44 }
  0x5c   : > { %1870 = vmatprep.mubr.f32.mxu1 %v8359_v6  ;;  %1880 = vmatprep.subr.mxu1 %v8507_v47 }
  0x61   : > { %1408 = vmatmul.mubr.f32.vlgmr.msra.gmra.mrb[2].mxu0 %v1245_v53  ;;  %1873 = vmatmul.mubr.f32.vlgmr.msra.gmra.mrb[2].mxu1 %v1245_v53 }
  0x62   : > { %1417 = vmatpush1.msra.mxu0 %v8511_v49  ;;  %1882 = vmatpush1.msra.mxu1 %v8513_v50 }
  0x63   : > { %1480 = vmatprep.mubr.f32.mxu0 %v8359_v6  ;;  %1493 = vmatprep.subr.mxu0 %v1257_v56  ;;  %v8675_v56 = vand.u32 4294901760, %v3101_v52 }
  0x64   : > { %1945 = vmatprep.mubr.f32.mxu1 %v8359_v6  ;;  %1958 = vmatprep.subr.mxu1 %v1722_v57 }
  0x65   : > { %v8691_v61 = vsub.f32 %v3101_v52, %v8675_v56 }
  0x67   : > { %v3195_v2 = vand.u32 4294901760, %v8691_v61 }
  0x69   : > { %1484 = vmatmul.mubr.f32.vlgmr.msra.gmra.mrb[2].mxu0 %v8536_v58  ;;  %1949 = vmatmul.mubr.f32.vlgmr.msra.gmra.mrb[2].mxu1 %v8536_v58  ;;  %v3196_v8 = vsub.f32 %v8691_v61, %v3195_v2 }
  0x6a   : > { %1497 = vmatpush1.msra.mxu0 %v1263_v59  ;;  %1962 = vmatpush1.msra.mxu1 %v1728_v60 }
  0x6b   : > { %1560 = vmatprep.mubr.f32.mxu0 %v8359_v6  ;;  %1569 = vmatprep.subr.mxu0 %v8503_v44  ;;  %v3093_v44 = vld [vmem:[%s9275_s1 + $0x8] sm:$0x77]  ;;  %v3197_v13 = vand.u32 4294901760, %v3196_v8 }
  0x6c   : > { %2025 = vmatprep.mubr.f32.mxu1 %v8359_v6  ;;  %2034 = vmatprep.subr.mxu1 %v8507_v47  ;;  %v3097_v46 = vcombine.high %v3093_v44, %v3093_v44  ;;  %v8013_v47 = vld [vmem:[%s8466_s5 + $0x18] sm:$0xff]  ;;  %v3105_v53 = vsel %vm202_vm0, %v3093_v44, 0 }
  0x6d   : > { %v8677_v57 = vand.u32 4294901760, %v3105_v53 }
  0x6f   : > { %v8694_v62 = vsub.f32 %v3105_v53, %v8677_v57 }
  0x71   : > { %1562 = vmatmul.mubr.f32.vlgmr.msra.gmra.mrb[2].mxu0 %v8509_v48  ;;  %2027 = vmatmul.mubr.f32.vlgmr.msra.gmra.mrb[2].mxu1 %v8509_v48  ;;  %v3660_v3 = vand.u32 4294901760, %v8694_v62 }
  0x72   : > { %1571 = vmatpush1.msra.mxu0 %v8511_v49  ;;  %2036 = vmatpush1.msra.mxu1 %v8513_v50  ;;  %v3107_v49 = vsel %vm202_vm0, %v3097_v46, 0  ;;  %v3099_v50 = vsel %vm198_vm1, %v8013_v47, 0 }
  0x73   : > { %1634 = vmatprep.mubr.f32.mxu0 %v8359_v6  ;;  %2099 = vmatprep.mubr.f32.mxu1 %v8359_v6  ;;  %v8669_v54 = vand.u32 4294901760, %v3107_v49  ;;  %v8673_v55 = vand.u32 4294901760, %v3099_v50  ;;  %v3661_v9 = vsub.f32 %v8694_v62, %v3660_v3 }
  0x74   : > { %2144 = vmatprep.subr.mxu0 %v8583_v16  ;;  %2609 = vmatprep.subr.mxu1 %v8587_v19 }
  0x75   : > { %v8687_v59 = vsub.f32 %v3107_v49, %v8669_v54  ;;  %v3177_v60 = vsub.f32 %v3099_v50, %v8673_v55  ;;  %v3662_v14 = vand.u32 4294901760, %v3661_v9  ;;  %v5024_v50 = vld [vmem:[%s9275_s1] sm:$0x77] }
  0x76   : > { %v5028_v52 = vcombine.high %v5024_v50, %v5024_v50 }
  0x77   : > { %v3654_v0 = vand.u32 4294901760, %v8687_v59  ;;  %v8700_v1 = vand.u32 4294901760, %v3177_v60 }
  0x79   : > { %1636 = vmatmul.mubr.f32.vlgmr.msra.gmra.mrb[2].mxu0 %v8509_v48  ;;  %2101 = vmatmul.mubr.f32.vlgmr.msra.gmra.mrb[2].mxu1 %v8509_v48  ;;  %v3103_v48 = vsel %vm202_vm0, %v3096_v45, 0  ;;  %v3655_v5 = vsub.f32 %v8687_v59, %v3654_v0  ;;  %v3179_v7 = vsub.f32 %v3177_v60, %v8700_v1 }
  0x7a   : > { %2146 = vmatpush1.msra.mxu0 %v8593_v21  ;;  %2611 = vmatpush1.msra.mxu1 %v8595_v22  ;;  %v8665_v51 = vand.u32 4294901760, %v3103_v48 }
  0x7b   : > { %2209 = vmatprep.mubr.f32.mxu0 %v8359_v6  ;;  %2226 = vmatprep.subr.mxu0 %v2225_v38  ;;  %v3656_v11 = vand.u32 4294901760, %v3655_v5  ;;  %v3180_v12 = vand.u32 4294901760, %v3179_v7 }
  0x7c   : > { %2674 = vmatprep.mubr.f32.mxu1 %v8359_v6  ;;  %2691 = vmatprep.subr.mxu1 %v2690_v39  ;;  %v8682_v58 = vsub.f32 %v3103_v48, %v8665_v51 }
  0x7d   : > { %2215 = vmatmul.mubr.f32.vlgmr.msra.gmra.mrb[4].mxu0 %v2214_v40  ;;  %2680 = vmatmul.mubr.f32.vlgmr.msra.gmra.mrb[4].mxu1 %v2214_v40 }
  0x7e   : > { %2232 = vmatpush1.msra.mxu0 %v2231_v41  ;;  %2697 = vmatpush1.msra.mxu1 %v2696_v42  ;;  %v3189_v63 = vand.u32 4294901760, %v8682_v58 }
  0x7f   : > { %2295 = vmatprep.mubr.f32.mxu0 %v8359_v6  ;;  %2305 = vmatprep.subr.mxu0 %v8600_v23 }
  0x80   : > { %2760 = vmatprep.mubr.f32.mxu1 %v8359_v6  ;;  %2770 = vmatprep.subr.mxu1 %v8605_v24  ;;  %v3190_v4 = vsub.f32 %v8682_v58, %v3189_v63  ;;  %v4067_v24 = vsel %vm202_vm0, %v4058_v15, 0 }
  0x82   : > { %v3191_v10 = vand.u32 4294901760, %v3190_v4 }
  0x85   : > { %2297 = vmatmul.mubr.f32.vlgmr.msra.gmra.mrb[4].mxu0 %v8591_v20  ;;  %2762 = vmatmul.mubr.f32.vlgmr.msra.gmra.mrb[4].mxu1 %v8591_v20 }
  0x86   : > { %2308 = vmatpush1.msra.mxu0 %v8609_v26  ;;  %2773 = vmatpush1.msra.mxu1 %v8612_v27 }
  0x87   : > { %2371 = vmatprep.mubr.f32.mxu0 %v8359_v6  ;;  %2381 = vmatprep.subr.mxu0 %v8583_v16 }
  0x88   : > { %2836 = vmatprep.mubr.f32.mxu1 %v8359_v6  ;;  %2846 = vmatprep.subr.mxu1 %v8587_v19 }
  0x8d   : > { %2374 = vmatmul.mubr.f32.vlgmr.msra.gmra.mrb[4].mxu0 %v2211_v25  ;;  %2839 = vmatmul.mubr.f32.vlgmr.msra.gmra.mrb[4].mxu1 %v2211_v25 }
  0x8e   : > { %2383 = vmatpush1.msra.mxu0 %v8593_v21  ;;  %2848 = vmatpush1.msra.mxu1 %v8595_v22 }
  0x8f   : > { %2446 = vmatprep.mubr.f32.mxu0 %v8359_v6  ;;  %2459 = vmatprep.subr.mxu0 %v2223_v28  ;;  %v8757_v28 = vand.u32 4294901760, %v4067_v24 }
  0x90   : > { %2911 = vmatprep.mubr.f32.mxu1 %v8359_v6  ;;  %2924 = vmatprep.subr.mxu1 %v2688_v29 }
  0x91   : > { %v8773_v33 = vsub.f32 %v4067_v24, %v8757_v28 }
  0x93   : > { %v4161_v38 = vand.u32 4294901760, %v8773_v33 }
  0x95   : > { %2450 = vmatmul.mubr.f32.vlgmr.msra.gmra.mrb[4].mxu0 %v8618_v30  ;;  %2915 = vmatmul.mubr.f32.vlgmr.msra.gmra.mrb[4].mxu1 %v8618_v30  ;;  %v4162_v43 = vsub.f32 %v8773_v33, %v4161_v38 }
  0x96   : > { %2463 = vmatpush1.msra.mxu0 %v2229_v31  ;;  %2928 = vmatpush1.msra.mxu1 %v2694_v32 }
  0x97   : > { %2526 = vmatprep.mubr.f32.mxu0 %v8359_v6  ;;  %2535 = vmatprep.subr.mxu0 %v8583_v16  ;;  %v4059_v16 = vld [vmem:[%s9275_s1 + $0x8] sm:$0x77]  ;;  %v4163_v48 = vand.u32 4294901760, %v4162_v43 }
  0x98   : > { %2991 = vmatprep.mubr.f32.mxu1 %v8359_v6  ;;  %3000 = vmatprep.subr.mxu1 %v8587_v19  ;;  %v4063_v18 = vcombine.high %v4059_v16, %v4059_v16  ;;  %v8018_v19 = vld [vmem:[%s8466_s5 + $0x20] sm:$0xff]  ;;  %v4071_v25 = vsel %vm202_vm0, %v4059_v16, 0 }
  0x99   : > { %v8759_v29 = vand.u32 4294901760, %v4071_v25 }
  0x9b   : > { %v8776_v34 = vsub.f32 %v4071_v25, %v8759_v29 }
  0x9d   : > { %2528 = vmatmul.mubr.f32.vlgmr.msra.gmra.mrb[4].mxu0 %v8591_v20  ;;  %2993 = vmatmul.mubr.f32.vlgmr.msra.gmra.mrb[4].mxu1 %v8591_v20  ;;  %v4626_v39 = vand.u32 4294901760, %v8776_v34 }
  0x9e   : > { %2537 = vmatpush1.msra.mxu0 %v8593_v21  ;;  %3002 = vmatpush1.msra.mxu1 %v8595_v22  ;;  %v4073_v21 = vsel %vm202_vm0, %v4063_v18, 0  ;;  %v4065_v22 = vsel %vm198_vm1, %v8018_v19, 0 }
  0x9f   : > { %2600 = vmatprep.mubr.f32.mxu0 %v8359_v6  ;;  %3065 = vmatprep.mubr.f32.mxu1 %v8359_v6  ;;  %v8751_v26 = vand.u32 4294901760, %v4073_v21  ;;  %v8755_v27 = vand.u32 4294901760, %v4065_v22  ;;  %v4627_v44 = vsub.f32 %v8776_v34, %v4626_v39 }
  0xa0   : > { %3110 = vmatprep.subr.mxu0 %v8665_v51  ;;  %3575 = vmatprep.subr.mxu1 %v8669_v54 }
  0xa1   : > { %v8769_v31 = vsub.f32 %v4073_v21, %v8751_v26  ;;  %v4143_v32 = vsub.f32 %v4065_v22, %v8755_v27  ;;  %v4628_v49 = vand.u32 4294901760, %v4627_v44  ;;  %v5990_v22 = vld [vmem:[%s9275_s1] sm:$0x77] }
  0xa2   : > { %v5994_v24 = vcombine.high %v5990_v22, %v5990_v22 }
  0xa3   : > { %v4620_v36 = vand.u32 4294901760, %v8769_v31  ;;  %v8782_v37 = vand.u32 4294901760, %v4143_v32 }
  0xa5   : > { %2602 = vmatmul.mubr.f32.vlgmr.msra.gmra.mrb[4].mxu0 %v8591_v20  ;;  %3067 = vmatmul.mubr.f32.vlgmr.msra.gmra.mrb[4].mxu1 %v8591_v20  ;;  %v4069_v20 = vsel %vm202_vm0, %v4062_v17, 0  ;;  %v4621_v41 = vsub.f32 %v8769_v31, %v4620_v36  ;;  %v4145_v42 = vsub.f32 %v4143_v32, %v8782_v37 }
  0xa6   : > { %3112 = vmatpush1.msra.mxu0 %v8675_v56  ;;  %3577 = vmatpush1.msra.mxu1 %v8677_v57  ;;  %v8747_v23 = vand.u32 4294901760, %v4069_v20 }
  0xa7   : > { %3175 = vmatprep.mubr.f32.mxu0 %v8359_v6  ;;  %3192 = vmatprep.subr.mxu0 %v3191_v10  ;;  %v4622_v46 = vand.u32 4294901760, %v4621_v41  ;;  %v4146_v47 = vand.u32 4294901760, %v4145_v42  ;;  %v169_v41 = vld [vmem:[%s9276_s2] sm:$0xf] }
  0xa8   : > { %3640 = vmatprep.mubr.f32.mxu1 %v8359_v6  ;;  %3657 = vmatprep.subr.mxu1 %v3656_v11  ;;  %v8764_v30 = vsub.f32 %v4069_v20, %v8747_v23 }
  0xa9   : > { %3181 = vmatmul.mubr.f32.vlgmr.msra.gmra.mrb[6].mxu0 %v3180_v12  ;;  %3646 = vmatmul.mubr.f32.vlgmr.msra.gmra.mrb[6].mxu1 %v3180_v12 }
  0xaa   : > { %3198 = vmatpush1.msra.mxu0 %v3197_v13  ;;  %3663 = vmatpush1.msra.mxu1 %v3662_v14  ;;  %v4155_v35 = vand.u32 4294901760, %v8764_v30 }
  0xab   : > { %3261 = vmatprep.mubr.f32.mxu0 %v8359_v6  ;;  %3271 = vmatprep.subr.mxu0 %v8682_v58 }
  0xac   : > { %3726 = vmatprep.mubr.f32.mxu1 %v8359_v6  ;;  %3736 = vmatprep.subr.mxu1 %v8687_v59  ;;  %v4156_v40 = vsub.f32 %v8764_v30, %v4155_v35  ;;  %v5033_v59 = vsel %vm202_vm0, %v5024_v50, 0 }
  0xae   : > { %v4157_v45 = vand.u32 4294901760, %v4156_v40 }
  0xb1   : > { %3263 = vmatmul.mubr.f32.vlgmr.msra.gmra.mrb[6].mxu0 %v8673_v55  ;;  %3728 = vmatmul.mubr.f32.vlgmr.msra.gmra.mrb[6].mxu1 %v8673_v55 }
  0xb2   : > { %3274 = vmatpush1.msra.mxu0 %v8691_v61  ;;  %3739 = vmatpush1.msra.mxu1 %v8694_v62 }
  0xb3   : > { %3337 = vmatprep.mubr.f32.mxu0 %v8359_v6  ;;  %3347 = vmatprep.subr.mxu0 %v8665_v51 }
  0xb4   : > { %3802 = vmatprep.mubr.f32.mxu1 %v8359_v6  ;;  %3812 = vmatprep.subr.mxu1 %v8669_v54 }
  0xb9   : > { %3340 = vmatmul.mubr.f32.vlgmr.msra.gmra.mrb[6].mxu0 %v3177_v60  ;;  %3805 = vmatmul.mubr.f32.vlgmr.msra.gmra.mrb[6].mxu1 %v3177_v60 }
  0xba   : > { %3349 = vmatpush1.msra.mxu0 %v8675_v56  ;;  %3814 = vmatpush1.msra.mxu1 %v8677_v57 }
  0xbb   : > { %3412 = vmatprep.mubr.f32.mxu0 %v8359_v6  ;;  %3425 = vmatprep.subr.mxu0 %v3189_v63  ;;  %v8839_v63 = vand.u32 4294901760, %v5033_v59 }
  0xbc   : > { %3877 = vmatprep.mubr.f32.mxu1 %v8359_v6  ;;  %3890 = vmatprep.subr.mxu1 %v3654_v0 }
  0xbd   : > { %v8855_v4 = vsub.f32 %v5033_v59, %v8839_v63 }
  0xbf   : > { %v5127_v10 = vand.u32 4294901760, %v8855_v4 }
  0xc1   : > { %3416 = vmatmul.mubr.f32.vlgmr.msra.gmra.mrb[6].mxu0 %v8700_v1  ;;  %3881 = vmatmul.mubr.f32.vlgmr.msra.gmra.mrb[6].mxu1 %v8700_v1  ;;  %v5128_v15 = vsub.f32 %v8855_v4, %v5127_v10 }
  0xc2   : > { %3429 = vmatpush1.msra.mxu0 %v3195_v2  ;;  %3894 = vmatpush1.msra.mxu1 %v3660_v3 }
  0xc3   : > { %3492 = vmatprep.mubr.f32.mxu0 %v8359_v6  ;;  %3501 = vmatprep.subr.mxu0 %v8665_v51  ;;  %v5025_v51 = vld [vmem:[%s9275_s1 + $0x8] sm:$0x77]  ;;  %v5129_v20 = vand.u32 4294901760, %v5128_v15 }
  0xc4   : > { %3957 = vmatprep.mubr.f32.mxu1 %v8359_v6  ;;  %3966 = vmatprep.subr.mxu1 %v8669_v54  ;;  %v5029_v53 = vcombine.high %v5025_v51, %v5025_v51  ;;  %v8023_v54 = vld [vmem:[%s8466_s5 + $0x28] sm:$0xff]  ;;  %v5037_v60 = vsel %vm202_vm0, %v5025_v51, 0 }
  0xc5   : > { %v8841_v0 = vand.u32 4294901760, %v5037_v60 }
  0xc7   : > { %v8858_v5 = vsub.f32 %v5037_v60, %v8841_v0 }
  0xc9   : > { %3494 = vmatmul.mubr.f32.vlgmr.msra.gmra.mrb[6].mxu0 %v8673_v55  ;;  %3959 = vmatmul.mubr.f32.vlgmr.msra.gmra.mrb[6].mxu1 %v8673_v55  ;;  %v5592_v11 = vand.u32 4294901760, %v8858_v5 }
  0xca   : > { %3503 = vmatpush1.msra.mxu0 %v8675_v56  ;;  %3968 = vmatpush1.msra.mxu1 %v8677_v57  ;;  %v5039_v56 = vsel %vm202_vm0, %v5029_v53, 0  ;;  %v5031_v57 = vsel %vm198_vm1, %v8023_v54, 0 }
  0xcb   : > { %3566 = vmatprep.mubr.f32.mxu0 %v8359_v6  ;;  %4031 = vmatprep.mubr.f32.mxu1 %v8359_v6  ;;  %v8833_v61 = vand.u32 4294901760, %v5039_v56  ;;  %v8837_v62 = vand.u32 4294901760, %v5031_v57  ;;  %v5593_v16 = vsub.f32 %v8858_v5, %v5592_v11 }
  0xcc   : > { %4076 = vmatprep.subr.mxu0 %v8747_v23  ;;  %4541 = vmatprep.subr.mxu1 %v8751_v26 }
  0xcd   : > { %v8851_v2 = vsub.f32 %v5039_v56, %v8833_v61  ;;  %v5109_v3 = vsub.f32 %v5031_v57, %v8837_v62  ;;  %v5594_v21 = vand.u32 4294901760, %v5593_v16 }
  0xcf   : > { %v5586_v8 = vand.u32 4294901760, %v8851_v2  ;;  %v8864_v9 = vand.u32 4294901760, %v5109_v3 }
  0xd1   : > { %3568 = vmatmul.mubr.f32.vlgmr.msra.gmra.mrb[6].mxu0 %v8673_v55  ;;  %4033 = vmatmul.mubr.f32.vlgmr.msra.gmra.mrb[6].mxu1 %v8673_v55  ;;  %v5035_v55 = vsel %vm202_vm0, %v5028_v52, 0  ;;  %v5587_v13 = vsub.f32 %v8851_v2, %v5586_v8  ;;  %v5111_v14 = vsub.f32 %v5109_v3, %v8864_v9 }
  0xd2   : > { %4078 = vmatpush1.msra.mxu0 %v8757_v28  ;;  %4543 = vmatpush1.msra.mxu1 %v8759_v29  ;;  %v8829_v58 = vand.u32 4294901760, %v5035_v55 }
  0xd3   : > { %4141 = vmatprep.mubr.f32.mxu0 %v8359_v6  ;;  %4158 = vmatprep.subr.mxu0 %v4157_v45  ;;  %v5588_v18 = vand.u32 4294901760, %v5587_v13  ;;  %v5112_v19 = vand.u32 4294901760, %v5111_v14 }
  0xd4   : > { %4606 = vmatprep.mubr.f32.mxu1 %v8359_v6  ;;  %4623 = vmatprep.subr.mxu1 %v4622_v46  ;;  %v8846_v1 = vsub.f32 %v5035_v55, %v8829_v58 }
  0xd5   : > { %4147 = vmatmul.mubr.f32.vlgmr.msra.gmra.mrb[8].mxu0 %v4146_v47  ;;  %4612 = vmatmul.mubr.f32.vlgmr.msra.gmra.mrb[8].mxu1 %v4146_v47 }
  0xd6   : > { %4164 = vmatpush1.msra.mxu0 %v4163_v48  ;;  %4629 = vmatpush1.msra.mxu1 %v4628_v49  ;;  %v5121_v7 = vand.u32 4294901760, %v8846_v1 }
  0xd7   : > { %4227 = vmatprep.mubr.f32.mxu0 %v8359_v6  ;;  %4237 = vmatprep.subr.mxu0 %v8764_v30 }
  0xd8   : > { %4692 = vmatprep.mubr.f32.mxu1 %v8359_v6  ;;  %4702 = vmatprep.subr.mxu1 %v8769_v31  ;;  %v5122_v12 = vsub.f32 %v8846_v1, %v5121_v7 }
  0xda   : > { %v5123_v17 = vand.u32 4294901760, %v5122_v12 }
  0xdd   : > { %4229 = vmatmul.mubr.f32.vlgmr.msra.gmra.mrb[8].mxu0 %v8755_v27  ;;  %4694 = vmatmul.mubr.f32.vlgmr.msra.gmra.mrb[8].mxu1 %v8755_v27 }
  0xde   : > { %4240 = vmatpush1.msra.mxu0 %v8773_v33  ;;  %4705 = vmatpush1.msra.mxu1 %v8776_v34  ;;  %v5999_v34 = vsel %vm202_vm0, %v5990_v22, 0  ;;  %v6957_v22 = vld [vmem:[%s9275_s1 + $0x8] sm:$0x77] }
  0xdf   : > { %4303 = vmatprep.mubr.f32.mxu0 %v8359_v6  ;;  %4313 = vmatprep.subr.mxu0 %v8747_v23 }
  0xe0   : > { %4768 = vmatprep.mubr.f32.mxu1 %v8359_v6  ;;  %4778 = vmatprep.subr.mxu1 %v8751_v26 }
  0xe5   : > { %4306 = vmatmul.mubr.f32.vlgmr.msra.gmra.mrb[8].mxu0 %v4143_v32  ;;  %4771 = vmatmul.mubr.f32.vlgmr.msra.gmra.mrb[8].mxu1 %v4143_v32 }
  0xe6   : > { %4315 = vmatpush1.msra.mxu0 %v8757_v28  ;;  %4780 = vmatpush1.msra.mxu1 %v8759_v29 }
  0xe7   : > { %4378 = vmatprep.mubr.f32.mxu0 %v8359_v6  ;;  %4391 = vmatprep.subr.mxu0 %v4155_v35 }
  0xe8   : > { %4843 = vmatprep.mubr.f32.mxu1 %v8359_v6  ;;  %4856 = vmatprep.subr.mxu1 %v4620_v36 }
  0xed   : > { %4382 = vmatmul.mubr.f32.vlgmr.msra.gmra.mrb[8].mxu0 %v8782_v37  ;;  %4847 = vmatmul.mubr.f32.vlgmr.msra.gmra.mrb[8].mxu1 %v8782_v37 }
  0xee   : > { %4395 = vmatpush1.msra.mxu0 %v4161_v38  ;;  %4860 = vmatpush1.msra.mxu1 %v4626_v39  ;;  %v8925_v39 = vand.u32 4294901760, %v5999_v34 }
  0xef   : > { %4458 = vmatprep.mubr.f32.mxu0 %v8359_v6  ;;  %4467 = vmatprep.subr.mxu0 %v8747_v23  ;;  %v5991_v23 = vld [vmem:[%s9275_s1 + $0x8] sm:$0x77] }
  0xf0   : > { %4923 = vmatprep.mubr.f32.mxu1 %v8359_v6  ;;  %4932 = vmatprep.subr.mxu1 %v8751_v26  ;;  %v5995_v25 = vcombine.high %v5991_v23, %v5991_v23  ;;  %v174_v26 = vlaneseq  ;;  %v6003_v35 = vsel %vm202_vm0, %v5991_v23, 0  ;;  %v8955_v49 = vsub.f32 %v5999_v34, %v8925_v39 }
  0xf1   : > { %v8937_v44 = vand.u32 4294901760, %v6003_v35  ;;  %v6969_v34 = vsel %vm202_vm0, %v6957_v22, 0 }
  0xf2   : > { %v175_v30 = vshrl.u32 %v174_v26, 7  ;;  %v8033_v26 = vld [vmem:[%s8466_s5 + $0x38] sm:$0xff] }
  0xf3   : > { %v8963_v53 = vsub.f32 %v6003_v35, %v8937_v44 }
  0xf4   : > { %v176_v37 = vsub.s32 0, %v175_v30  ;;  %v184_v38 = vsub.s32 2, %v175_v30  ;;  %v180_v42 = vsub.s32 1, %v175_v30  ;;  %v188_v43 = vsub.s32 3, %v175_v30 }
  0xf5   : > { %4460 = vmatmul.mubr.f32.vlgmr.msra.gmra.mrb[8].mxu0 %v8755_v27  ;;  %4925 = vmatmul.mubr.f32.vlgmr.msra.gmra.mrb[8].mxu1 %v8755_v27 }
  0xf6   : > { %4469 = vmatpush1.msra.mxu0 %v8757_v28  ;;  %4934 = vmatpush1.msra.mxu1 %v8759_v29  ;;  %v8028_v28 = vld [vmem:[%s8466_s5 + $0x30] sm:$0xff]  ;;  %v6005_v29 = vsel %vm202_vm0, %v5995_v25, 0  ;;  %v8950_v47 = vrot.slane %v169_v41, %v176_v37  ;;  %v8952_v48 = vrot.slane %v169_v41, %v184_v38  ;;  %v8958_v51 = vrot.slane %v169_v41, %v180_v42  ;;  %s8044_s5 = sshll.u32 %s8404_s16, 12 }
  0xf7   : > { %4532 = vmatprep.mubr.f32.mxu0 %v8359_v6  ;;  %4997 = vmatprep.mubr.f32.mxu1 %v8359_v6  ;;  %v5997_v32 = vsel %vm198_vm1, %v8028_v28, 0  ;;  %v8917_v33 = vand.u32 4294901760, %v6005_v29  ;;  %v8960_v52 = vrot.slane %v169_v41, %v188_v43  ;;  %s9222_s7 = scalar_lea.hbm %s9277_s3, %s8044_s5 }
  0xf8   : > { %5042 = vmatprep.subr.mxu0 %v8829_v58  ;;  %5507 = vmatprep.subr.mxu1 %v8833_v61  ;;  %v8921_v36 = vand.u32 4294901760, %v5997_v32 }
  0xf9   : > { %v8940_v45 = vsub.f32 %v6005_v29, %v8917_v33  ;;  %v6963_v29 = vsel %vm198_vm1, %v8033_v26, 0 }
  0xfa   : > { %v8948_v46 = vsub.f32 %v5997_v32, %v8921_v36  ;;  %v9053_v35 = vand.u32 4294901760, %v6963_v29 }
  0xfb   : > { %v6552_v54 = vand.u32 4294901760, %v8940_v45 }
  0xfc   : > { %v8971_v57 = vand.u32 4294901760, %v8948_v46  ;;  %v9076_v42 = vsub.f32 %v6963_v29, %v9053_v35 }
  0xfd   : > { %4534 = vmatmul.mubr.f32.vlgmr.msra.gmra.mrb[8].mxu0 %v8755_v27  ;;  %4999 = vmatmul.mubr.f32.vlgmr.msra.gmra.mrb[8].mxu1 %v8755_v27  ;;  %v6001_v27 = vsel %vm202_vm0, %v5994_v24, 0  ;;  %v6961_v24 = vcombine.high %v6957_v22, %v6957_v22 }
  0xfe   : > { %5044 = vmatpush1.msra.mxu0 %v8839_v63  ;;  %5509 = vmatpush1.msra.mxu1 %v8841_v0  ;;  %v8914_v31 = vand.u32 4294901760, %v6001_v27  ;;  %v6077_v12 = vsub.f32 %v8948_v46, %v8971_v57 }
  0xff   : > { %5107 = vmatprep.mubr.f32.mxu0 %v8359_v6  ;;  %5124 = vmatprep.subr.mxu0 %v5123_v17 }
 0x100   : > { %5572 = vmatprep.mubr.f32.mxu1 %v8359_v6  ;;  %5589 = vmatprep.subr.mxu1 %v5588_v18  ;;  %v8928_v40 = vsub.f32 %v6001_v27, %v8914_v31  ;;  %v6971_v27 = vsel %vm202_vm0, %v6961_v24, 0 }
 0x101   : > { %5113 = vmatmul.mubr.f32.vlgmr.msra.gmra.mrb[10].mxu0 %v5112_v19  ;;  %5578 = vmatmul.mubr.f32.vlgmr.msra.gmra.mrb[10].mxu1 %v5112_v19  ;;  %v6078_v19 = vand.u32 4294901760, %v6077_v12  ;;  %v9049_v30 = vand.u32 4294901760, %v6971_v27 }
 0x102   : > { %5130 = vmatpush1.msra.mxu0 %v5129_v20  ;;  %5595 = vmatpush1.msra.mxu1 %v5594_v21  ;;  %v6087_v50 = vand.u32 4294901760, %v8928_v40 }
 0x103   : > { %5193 = vmatprep.mubr.f32.mxu0 %v8359_v6  ;;  %5203 = vmatprep.subr.mxu0 %v8846_v1  ;;  %v9069_v41 = vsub.f32 %v6971_v27, %v9049_v30 }
 0x104   : > { %5658 = vmatprep.mubr.f32.mxu1 %v8359_v6  ;;  %5668 = vmatprep.subr.mxu1 %v8851_v2  ;;  %v6088_v1 = vsub.f32 %v8928_v40, %v6087_v50  ;;  %v6093_v2 = vand.u32 4294901760, %v8955_v49 }
 0x106   : > { %v6094_v15 = vsub.f32 %v8955_v49, %v6093_v2  ;;  %v6089_v17 = vand.u32 4294901760, %v6088_v1 }
 0x108   : > { %v6095_v20 = vand.u32 4294901760, %v6094_v15 }
 0x109   : > { %5195 = vmatmul.mubr.f32.vlgmr.msra.gmra.mrb[10].mxu0 %v8837_v62  ;;  %5660 = vmatmul.mubr.f32.vlgmr.msra.gmra.mrb[10].mxu1 %v8837_v62 }
 0x10a   : > { %5206 = vmatpush1.msra.mxu0 %v8855_v4  ;;  %5671 = vmatpush1.msra.mxu1 %v8858_v5  ;;  %v6553_v5 = vsub.f32 %v8940_v45, %v6552_v54 }
 0x10b   : > { %5269 = vmatprep.mubr.f32.mxu0 %v8359_v6  ;;  %5279 = vmatprep.subr.mxu0 %v8829_v58 }
 0x10c   : > { %5734 = vmatprep.mubr.f32.mxu1 %v8359_v6  ;;  %5744 = vmatprep.subr.mxu1 %v8833_v61  ;;  %v6554_v18 = vand.u32 4294901760, %v6553_v5 }
 0x111   : > { %5272 = vmatmul.mubr.f32.vlgmr.msra.gmra.mrb[10].mxu0 %v5109_v3  ;;  %5737 = vmatmul.mubr.f32.vlgmr.msra.gmra.mrb[10].mxu1 %v5109_v3 }
 0x112   : > { %5281 = vmatpush1.msra.mxu0 %v8839_v63  ;;  %5746 = vmatpush1.msra.mxu1 %v8841_v0 }
 0x113   : > { %5344 = vmatprep.mubr.f32.mxu0 %v8359_v6  ;;  %5357 = vmatprep.subr.mxu0 %v5121_v7  ;;  %v6558_v7 = vand.u32 4294901760, %v8963_v53 }
 0x114   : > { %5809 = vmatprep.mubr.f32.mxu1 %v8359_v6  ;;  %5822 = vmatprep.subr.mxu1 %v5586_v8 }
 0x115   : > { %v6559_v16 = vsub.f32 %v8963_v53, %v6558_v7 }
 0x117   : > { %v6560_v21 = vand.u32 4294901760, %v6559_v16 }
 0x119   : > { %5348 = vmatmul.mubr.f32.vlgmr.msra.gmra.mrb[10].mxu0 %v8864_v9  ;;  %5813 = vmatmul.mubr.f32.vlgmr.msra.gmra.mrb[10].mxu1 %v8864_v9 }
 0x11a   : > { %5361 = vmatpush1.msra.mxu0 %v5127_v10  ;;  %5826 = vmatpush1.msra.mxu1 %v5592_v11 }
 0x11b   : > { %5424 = vmatprep.mubr.f32.mxu0 %v8359_v6  ;;  %5433 = vmatprep.subr.mxu0 %v8829_v58 }
 0x11c   : > { %5889 = vmatprep.mubr.f32.mxu1 %v8359_v6  ;;  %5898 = vmatprep.subr.mxu1 %v8833_v61 }
 0x120   : > { %v671_v55 = vpop.f32.mrb[0].mxu0  ;;  %v1136_v56 = vpop.f32.mrb[0].mxu1 }
 0x121   : > { %v8045_v58 = vadd.f32 %v671_v55, %v8950_v47  ;;  %v8047_v59 = vadd.f32 %v1136_v56, %v8952_v48  ;;  %v673_v60 = vpop.f32.mrb[1].mxu0  ;;  %v1138_v61 = vpop.f32.mrb[1].mxu1  ;;  %5426 = vmatmul.mubr.f32.vlgmr.msra.gmra.mrb[10].mxu0 %v8837_v62  ;;  %5891 = vmatmul.mubr.f32.vlgmr.msra.gmra.mrb[10].mxu1 %v8837_v62 }
 0x122   : > { %v8046_v3 = vadd.f32 %v673_v60, %v8958_v51  ;;  %v8048_v4 = vadd.f32 %v1138_v61, %v8960_v52  ;;  %5435 = vmatpush1.msra.mxu0 %v8839_v63  ;;  %5900 = vmatpush1.msra.mxu1 %v8841_v0 }
 0x123   : > { %vm1141_vm3 = vcmp.ge.f32.partialorder %v8045_v58, 0.0  ;;  %v1145_v8 = vmul.f32 0.2, %v8045_v58  ;;  %vm1143_vm4 = vcmp.ge.f32.partialorder %v8047_v59, 0.0  ;;  %v1147_v9 = vmul.f32 0.2, %v8047_v59  ;;  %5498 = vmatprep.mubr.f32.mxu0 %v8359_v6  ;;  %5963 = vmatprep.mubr.f32.mxu1 %v8359_v6 }
 0x124   : > { %vm1142_vm5 = vcmp.ge.f32.partialorder %v8046_v3, 0.0  ;;  %v1146_v10 = vmul.f32 0.2, %v8046_v3  ;;  %vm1144_vm6 = vcmp.ge.f32.partialorder %v8048_v4, 0.0  ;;  %v1148_v63 = vmul.f32 0.2, %v8048_v4  ;;  %6008 = vmatprep.subr.mxu0 %v8914_v31  ;;  %6473 = vmatprep.subr.mxu1 %v8917_v33 }
 0x125   : > { %v1149_v0 = vsel %vm1141_vm3, %v8045_v58, %v1145_v8  ;;  %v1151_v11 = vsel %vm1143_vm4, %v8047_v59, %v1147_v9 }
 0x126   : > { %1153 = vst [vmem:[%s8996_s26] sm:$0xff] %v1149_v0  ;;  %1155 = vst [vmem:[%s8996_s26 + $0x10] sm:$0xff] %v1151_v11  ;;  %v1150_v13 = vsel %vm1142_vm5, %v8046_v3, %v1146_v10  ;;  %v1152_v14 = vsel %vm1144_vm6, %v8048_v4, %v1148_v63 }
 0x127   : > { %1154 = vst [vmem:[%s8996_s26 + $0x8] sm:$0xff] %v1150_v13  ;;  %1157 = vst.msk [vmem:[%s8996_s26 + $0x18] sm:$0xff] %vm1156_vm2, %v1152_v14 }
 0x129   : > { %5500 = vmatmul.mubr.f32.vlgmr.msra.gmra.mrb[10].mxu0 %v8837_v62  ;;  %5965 = vmatmul.mubr.f32.vlgmr.msra.gmra.mrb[10].mxu1 %v8837_v62  ;;  %v6956_v62 = vld [vmem:[%s9275_s1] sm:$0x77] }
 0x12a   : > { %6010 = vmatpush1.msra.mxu0 %v8925_v39  ;;  %6475 = vmatpush1.msra.mxu1 %v8937_v44  ;;  %v6960_v23 = vcombine.high %v6956_v62, %v6956_v62  ;;  %v6965_v32 = vsel %vm202_vm0, %v6956_v62, 0 }
 0x12b   : > { %6073 = vmatprep.mubr.f32.mxu0 %v8359_v6  ;;  %6090 = vmatprep.subr.mxu0 %v6089_v17  ;;  %v9057_v37 = vand.u32 4294901760, %v6965_v32 }
 0x12c   : > { %6538 = vmatprep.mubr.f32.mxu1 %v8359_v6  ;;  %6555 = vmatprep.subr.mxu1 %v6554_v18  ;;  %v6967_v25 = vsel %vm202_vm0, %v6960_v23, 0 }
 0x12d   : > { %6079 = vmatmul.mubr.f32.vlgmr.msra.gmra.mrb[12].mxu0 %v6078_v19  ;;  %6544 = vmatmul.mubr.f32.vlgmr.msra.gmra.mrb[12].mxu1 %v6078_v19  ;;  %v9046_v28 = vand.u32 4294901760, %v6967_v25  ;;  %v9079_v43 = vsub.f32 %v6965_v32, %v9057_v37 }
 0x12e   : > { %6096 = vmatpush1.msra.mxu0 %v6095_v20  ;;  %6561 = vmatpush1.msra.mxu1 %v6560_v21 }
 0x12f   : > { %6159 = vmatprep.mubr.f32.mxu0 %v8359_v6  ;;  %6169 = vmatprep.subr.mxu0 %v8928_v40  ;;  %v9060_v38 = vsub.f32 %v6967_v25, %v9046_v28  ;;  %v9066_v40 = vand.u32 4294901760, %v6969_v34  ;;  %v7059_v58 = vand.u32 4294901760, %v9079_v43 }
 0x130   : > { %6624 = vmatprep.mubr.f32.mxu1 %v8359_v6  ;;  %6634 = vmatprep.subr.mxu1 %v8940_v45 }
 0x131   : > { %v7053_v45 = vand.u32 4294901760, %v9060_v38  ;;  %v7060_v10 = vsub.f32 %v9079_v43, %v7059_v58 }
 0x133   : > { %v7061_v13 = vand.u32 4294901760, %v7060_v10 }
 0x135   : > { %6161 = vmatmul.mubr.f32.vlgmr.msra.gmra.mrb[12].mxu0 %v8921_v36  ;;  %6626 = vmatmul.mubr.f32.vlgmr.msra.gmra.mrb[12].mxu1 %v8921_v36 }
 0x136   : > { %6172 = vmatpush1.msra.mxu0 %v8955_v49  ;;  %6637 = vmatpush1.msra.mxu1 %v8963_v53  ;;  %v7518_v49 = vand.u32 4294901760, %v9069_v41 }
 0x137   : > { %6235 = vmatprep.mubr.f32.mxu0 %v8359_v6  ;;  %6245 = vmatprep.subr.mxu0 %v8914_v31 }
 0x138   : > { %6700 = vmatprep.mubr.f32.mxu1 %v8359_v6  ;;  %6710 = vmatprep.subr.mxu1 %v8917_v33  ;;  %v7519_v61 = vsub.f32 %v9069_v41, %v7518_v49 }
 0x13a   : > { %v7520_v11 = vand.u32 4294901760, %v7519_v61 }
 0x13d   : > { %6238 = vmatmul.mubr.f32.vlgmr.msra.gmra.mrb[12].mxu0 %v8948_v46  ;;  %6703 = vmatmul.mubr.f32.vlgmr.msra.gmra.mrb[12].mxu1 %v8948_v46  ;;  %v9083_v46 = vsub.f32 %v6969_v34, %v9066_v40 }
 0x13e   : > { %6247 = vmatpush1.msra.mxu0 %v8925_v39  ;;  %6712 = vmatpush1.msra.mxu1 %v8937_v44 }
 0x13f   : > { %6310 = vmatprep.mubr.f32.mxu0 %v8359_v6  ;;  %6323 = vmatprep.subr.mxu0 %v6087_v50  ;;  %v7524_v1 = vand.u32 4294901760, %v9083_v46 }
 0x140   : > { %6775 = vmatprep.mubr.f32.mxu1 %v8359_v6  ;;  %6788 = vmatprep.subr.mxu1 %v6552_v54 }
 0x141   : > { %v7525_v63 = vsub.f32 %v9083_v46, %v7524_v1 }
 0x143   : > { %v7526_v14 = vand.u32 4294901760, %v7525_v63 }
 0x145   : > { %6314 = vmatmul.mubr.f32.vlgmr.msra.gmra.mrb[12].mxu0 %v8971_v57  ;;  %6779 = vmatmul.mubr.f32.vlgmr.msra.gmra.mrb[12].mxu1 %v8971_v57  ;;  %v7054_v57 = vsub.f32 %v9060_v38, %v7053_v45 }
 0x146   : > { %6327 = vmatpush1.msra.mxu0 %v6093_v2  ;;  %6792 = vmatpush1.msra.mxu1 %v6558_v7 }
 0x147   : > { %6390 = vmatprep.mubr.f32.mxu0 %v8359_v6  ;;  %6399 = vmatprep.subr.mxu0 %v8914_v31  ;;  %v9087_v31 = vand.u32 4294901760, %v9076_v42  ;;  %v7055_v0 = vand.u32 4294901760, %v7054_v57 }
 0x148   : > { %6855 = vmatprep.mubr.f32.mxu1 %v8359_v6  ;;  %6864 = vmatprep.subr.mxu1 %v8917_v33 }
 0x149   : > { %v7043_v7 = vsub.f32 %v9076_v42, %v9087_v31 }
 0x14b   : > { %v7044_v12 = vand.u32 4294901760, %v7043_v7 }
 0x14c   : > { %v1637_v50 = vpop.f32.mrb[2].mxu0  ;;  %v2102_v53 = vpop.f32.mrb[2].mxu1 }
 0x14d   : > { %v8049_v33 = vadd.f32 %v1637_v50, %v8950_v47  ;;  %v8051_v54 = vadd.f32 %v2102_v53, %v8952_v48  ;;  %v1639_v55 = vpop.f32.mrb[3].mxu0  ;;  %v2104_v56 = vpop.f32.mrb[3].mxu1  ;;  %6392 = vmatmul.mubr.f32.vlgmr.msra.gmra.mrb[12].mxu0 %v8921_v36  ;;  %6857 = vmatmul.mubr.f32.vlgmr.msra.gmra.mrb[12].mxu1 %v8921_v36 }
 0x14e   : > { %v8050_v59 = vadd.f32 %v1639_v55, %v8958_v51  ;;  %v8052_v60 = vadd.f32 %v2104_v56, %v8960_v52  ;;  %6401 = vmatpush1.msra.mxu0 %v8925_v39  ;;  %6866 = vmatpush1.msra.mxu1 %v8937_v44 }
 0x14f   : > { %vm2107_vm7 = vcmp.ge.f32.partialorder %v8049_v33, 0.0  ;;  %v2111_v2 = vmul.f32 0.2, %v8049_v33  ;;  %vm2109_vm8 = vcmp.ge.f32.partialorder %v8051_v54, 0.0  ;;  %v2113_v3 = vmul.f32 0.2, %v8051_v54  ;;  %6464 = vmatprep.mubr.f32.mxu0 %v8359_v6  ;;  %6929 = vmatprep.mubr.f32.mxu1 %v8359_v6 }
 0x150   : > { %vm2108_vm9 = vcmp.ge.f32.partialorder %v8050_v59, 0.0  ;;  %v2112_v39 = vmul.f32 0.2, %v8050_v59  ;;  %vm2110_vm10 = vcmp.ge.f32.partialorder %v8052_v60, 0.0  ;;  %v2114_v44 = vmul.f32 0.2, %v8052_v60  ;;  %6974 = vmatprep.subr.mxu0 %v9046_v28  ;;  %7439 = vmatprep.subr.mxu1 %v9049_v30 }
 0x151   : > { %v2115_v4 = vsel %vm2107_vm7, %v8049_v33, %v2111_v2  ;;  %v2117_v5 = vsel %vm2109_vm8, %v8051_v54, %v2113_v3 }
 0x152   : > { %8004 = vst [vmem:[%s8996_s26 + $0x20] sm:$0xff] %v2115_v4  ;;  %8006 = vst [vmem:[%s8996_s26 + $0x30] sm:$0xff] %v2117_v5  ;;  %v2116_v8 = vsel %vm2108_vm9, %v8050_v59, %v2112_v39  ;;  %v2118_v9 = vsel %vm2110_vm10, %v8052_v60, %v2114_v44 }
 0x153   : > { %8005 = vst [vmem:[%s8996_s26 + $0x28] sm:$0xff] %v2116_v8  ;;  %8007 = vst.msk [vmem:[%s8996_s26 + $0x38] sm:$0xff] %vm1156_vm2, %v2118_v9 }
 0x155   : > { %6466 = vmatmul.mubr.f32.vlgmr.msra.gmra.mrb[12].mxu0 %v8921_v36  ;;  %6931 = vmatmul.mubr.f32.vlgmr.msra.gmra.mrb[12].mxu1 %v8921_v36 }
 0x156   : > { %6976 = vmatpush1.msra.mxu0 %v9057_v37  ;;  %7441 = vmatpush1.msra.mxu1 %v9066_v40 }
 0x157   : > { %7039 = vmatprep.mubr.f32.mxu0 %v8359_v6  ;;  %7056 = vmatprep.subr.mxu0 %v7055_v0 }
 0x158   : > { %7504 = vmatprep.mubr.f32.mxu1 %v8359_v6  ;;  %7521 = vmatprep.subr.mxu1 %v7520_v11 }
 0x159   : > { %7045 = vmatmul.mubr.f32.vlgmr.msra.gmra.mrb[14].mxu0 %v7044_v12  ;;  %7510 = vmatmul.mubr.f32.vlgmr.msra.gmra.mrb[14].mxu1 %v7044_v12 }
 0x15a   : > { %7062 = vmatpush1.msra.mxu0 %v7061_v13  ;;  %7527 = vmatpush1.msra.mxu1 %v7526_v14 }
 0x15b   : > { %7125 = vmatprep.mubr.f32.mxu0 %v8359_v6  ;;  %7135 = vmatprep.subr.mxu0 %v9060_v38 }
 0x15c   : > { %7590 = vmatprep.mubr.f32.mxu1 %v8359_v6  ;;  %7600 = vmatprep.subr.mxu1 %v9069_v41 }
 0x161   : > { %7127 = vmatmul.mubr.f32.vlgmr.msra.gmra.mrb[14].mxu0 %v9053_v35  ;;  %7592 = vmatmul.mubr.f32.vlgmr.msra.gmra.mrb[14].mxu1 %v9053_v35 }
 0x162   : > { %7138 = vmatpush1.msra.mxu0 %v9079_v43  ;;  %7603 = vmatpush1.msra.mxu1 %v9083_v46 }
 0x163   : > { %7201 = vmatprep.mubr.f32.mxu0 %v8359_v6  ;;  %7211 = vmatprep.subr.mxu0 %v9046_v28 }
 0x164   : > { %7666 = vmatprep.mubr.f32.mxu1 %v8359_v6  ;;  %7676 = vmatprep.subr.mxu1 %v9049_v30 }
 0x169   : > { %7204 = vmatmul.mubr.f32.vlgmr.msra.gmra.mrb[14].mxu0 %v9076_v42  ;;  %7669 = vmatmul.mubr.f32.vlgmr.msra.gmra.mrb[14].mxu1 %v9076_v42 }
 0x16a   : > { %7213 = vmatpush1.msra.mxu0 %v9057_v37  ;;  %7678 = vmatpush1.msra.mxu1 %v9066_v40 }
 0x16b   : > { %7276 = vmatprep.mubr.f32.mxu0 %v8359_v6  ;;  %7289 = vmatprep.subr.mxu0 %v7053_v45 }
 0x16c   : > { %7741 = vmatprep.mubr.f32.mxu1 %v8359_v6  ;;  %7754 = vmatprep.subr.mxu1 %v7518_v49 }
 0x171   : > { %7280 = vmatmul.mubr.f32.vlgmr.msra.gmra.mrb[14].mxu0 %v9087_v31  ;;  %7745 = vmatmul.mubr.f32.vlgmr.msra.gmra.mrb[14].mxu1 %v9087_v31 }
 0x172   : > { %7293 = vmatpush1.msra.mxu0 %v7059_v58  ;;  %7758 = vmatpush1.msra.mxu1 %v7524_v1 }
 0x173   : > { %7356 = vmatprep.mubr.f32.mxu0 %v8359_v6  ;;  %7365 = vmatprep.subr.mxu0 %v9046_v28 }
 0x174   : > { %7821 = vmatprep.mubr.f32.mxu1 %v8359_v6  ;;  %7830 = vmatprep.subr.mxu1 %v9049_v30 }
 0x178   : > { %v2603_v36 = vpop.f32.mrb[4].mxu0  ;;  %v3068_v15 = vpop.f32.mrb[4].mxu1 }
 0x179   : > { %v8053_v16 = vadd.f32 %v2603_v36, %v8950_v47  ;;  %v8055_v17 = vadd.f32 %v3068_v15, %v8952_v48  ;;  %v2605_v18 = vpop.f32.mrb[5].mxu0  ;;  %v3070_v19 = vpop.f32.mrb[5].mxu1  ;;  %7358 = vmatmul.mubr.f32.vlgmr.msra.gmra.mrb[14].mxu0 %v9053_v35  ;;  %7823 = vmatmul.mubr.f32.vlgmr.msra.gmra.mrb[14].mxu1 %v9053_v35 }
 0x17a   : > { %v8054_v20 = vadd.f32 %v2605_v18, %v8958_v51  ;;  %v8056_v21 = vadd.f32 %v3070_v19, %v8960_v52  ;;  %7367 = vmatpush1.msra.mxu0 %v9057_v37  ;;  %7832 = vmatpush1.msra.mxu1 %v9066_v40 }
 0x17b   : > { %vm3073_vm11 = vcmp.ge.f32.partialorder %v8053_v16, 0.0  ;;  %v3077_v62 = vmul.f32 0.2, %v8053_v16  ;;  %vm3075_vm12 = vcmp.ge.f32.partialorder %v8055_v17, 0.0  ;;  %v3079_v22 = vmul.f32 0.2, %v8055_v17  ;;  %7430 = vmatprep.mubr.f32.mxu0 %v8359_v6  ;;  %7895 = vmatprep.mubr.f32.mxu1 %v8359_v6 }
 0x17c   : > { %vm3074_vm13 = vcmp.ge.f32.partialorder %v8054_v20, 0.0  ;;  %v3078_v23 = vmul.f32 0.2, %v8054_v20  ;;  %vm3076_vm14 = vcmp.ge.f32.partialorder %v8056_v21, 0.0  ;;  %v3080_v24 = vmul.f32 0.2, %v8056_v21 }
 0x17d   : > { %v3081_v25 = vsel %vm3073_vm11, %v8053_v16, %v3077_v62  ;;  %v3083_v26 = vsel %vm3075_vm12, %v8055_v17, %v3079_v22 }
 0x17e   : > { %8009 = vst [vmem:[%s8996_s26 + $0x40] sm:$0xff] %v3081_v25  ;;  %8011 = vst [vmem:[%s8996_s26 + $0x50] sm:$0xff] %v3083_v26  ;;  %v3082_v27 = vsel %vm3074_vm13, %v8054_v20, %v3078_v23  ;;  %v3084_v28 = vsel %vm3076_vm14, %v8056_v21, %v3080_v24 }
 0x17f   : > { %8010 = vst [vmem:[%s8996_s26 + $0x48] sm:$0xff] %v3082_v27  ;;  %8012 = vst.msk [vmem:[%s8996_s26 + $0x58] sm:$0xff] %vm1156_vm2, %v3084_v28 }
 0x181   : > { %7432 = vmatmul.mubr.f32.vlgmr.msra.gmra.mrb[14].mxu0 %v9053_v35  ;;  %7897 = vmatmul.mubr.f32.vlgmr.msra.gmra.mrb[14].mxu1 %v9053_v35 }
 0x1a4   : > { %v3569_v29 = vpop.f32.mrb[6].mxu0  ;;  %v4034_v30 = vpop.f32.mrb[6].mxu1 }
 0x1a5   : > { %v8057_v6 = vadd.f32 %v3569_v29, %v8950_v47  ;;  %v8059_v32 = vadd.f32 %v4034_v30, %v8952_v48  ;;  %v3571_v34 = vpop.f32.mrb[7].mxu0  ;;  %v4036_v37 = vpop.f32.mrb[7].mxu1 }
 0x1a6   : > { %v8058_v38 = vadd.f32 %v3571_v34, %v8958_v51  ;;  %v8060_v40 = vadd.f32 %v4036_v37, %v8960_v52 }
 0x1a7   : > { %vm4039_vm15 = vcmp.ge.f32.partialorder %v8057_v6, 0.0  ;;  %v4043_v41 = vmul.f32 0.2, %v8057_v6  ;;  %vm4041_vm0 = vcmp.ge.f32.partialorder %v8059_v32, 0.0  ;;  %v4045_v35 = vmul.f32 0.2, %v8059_v32 }
 0x1a8   : > { %vm4040_vm1 = vcmp.ge.f32.partialorder %v8058_v38, 0.0  ;;  %v4044_v42 = vmul.f32 0.2, %v8058_v38  ;;  %vm4042_vm3 = vcmp.ge.f32.partialorder %v8060_v40, 0.0  ;;  %v4046_v43 = vmul.f32 0.2, %v8060_v40 }
 0x1a9   : > { %v4047_v45 = vsel %vm4039_vm15, %v8057_v6, %v4043_v41  ;;  %v4049_v46 = vsel %vm4041_vm0, %v8059_v32, %v4045_v35 }
 0x1aa   : > { %8014 = vst [vmem:[%s8996_s26 + $0x60] sm:$0xff] %v4047_v45  ;;  %8016 = vst [vmem:[%s8996_s26 + $0x70] sm:$0xff] %v4049_v46  ;;  %v4048_v49 = vsel %vm4040_vm1, %v8058_v38, %v4044_v42  ;;  %v4050_v50 = vsel %vm4042_vm3, %v8060_v40, %v4046_v43 }
 0x1ab   : > { %8015 = vst [vmem:[%s8996_s26 + $0x68] sm:$0xff] %v4048_v49  ;;  %8017 = vst.msk [vmem:[%s8996_s26 + $0x78] sm:$0xff] %vm1156_vm2, %v4050_v50 }
 0x1d0   : > { %v4535_v53 = vpop.f32.mrb[8].mxu0  ;;  %v5000_v31 = vpop.f32.mrb[8].mxu1 }
 0x1d1   : > { %v8061_v33 = vadd.f32 %v4535_v53, %v8950_v47  ;;  %v8063_v54 = vadd.f32 %v5000_v31, %v8952_v48  ;;  %v4537_v55 = vpop.f32.mrb[9].mxu0  ;;  %v5002_v56 = vpop.f32.mrb[9].mxu1 }
 0x1d2   : > { %v8062_v57 = vadd.f32 %v4537_v55, %v8958_v51  ;;  %v8064_v58 = vadd.f32 %v5002_v56, %v8960_v52 }
 0x1d3   : > { %vm5005_vm4 = vcmp.ge.f32.partialorder %v8061_v33, 0.0  ;;  %v5009_v59 = vmul.f32 0.2, %v8061_v33  ;;  %vm5007_vm5 = vcmp.ge.f32.partialorder %v8063_v54, 0.0  ;;  %v5011_v60 = vmul.f32 0.2, %v8063_v54 }
 0x1d4   : > { %vm5006_vm6 = vcmp.ge.f32.partialorder %v8062_v57, 0.0  ;;  %v5010_v61 = vmul.f32 0.2, %v8062_v57  ;;  %vm5008_vm7 = vcmp.ge.f32.partialorder %v8064_v58, 0.0  ;;  %v5012_v1 = vmul.f32 0.2, %v8064_v58 }
 0x1d5   : > { %v5013_v2 = vsel %vm5005_vm4, %v8061_v33, %v5009_v59  ;;  %v5015_v3 = vsel %vm5007_vm5, %v8063_v54, %v5011_v60 }
 0x1d6   : > { %8019 = vst [vmem:[%s8996_s26 + $0x80] sm:$0xff] %v5013_v2  ;;  %8021 = vst [vmem:[%s8996_s26 + $0x90] sm:$0xff] %v5015_v3  ;;  %v5014_v39 = vsel %vm5006_vm6, %v8062_v57, %v5010_v61  ;;  %v5016_v44 = vsel %vm5008_vm7, %v8064_v58, %v5012_v1 }
 0x1d7   : > { %8020 = vst [vmem:[%s8996_s26 + $0x88] sm:$0xff] %v5014_v39  ;;  %8022 = vst.msk [vmem:[%s8996_s26 + $0x98] sm:$0xff] %vm1156_vm2, %v5016_v44 }
 0x1fc   : > { %v5501_v4 = vpop.f32.mrb[10].mxu0  ;;  %v5966_v5 = vpop.f32.mrb[10].mxu1 }
 0x1fd   : > { %v8065_v7 = vadd.f32 %v5501_v4, %v8950_v47  ;;  %v8067_v8 = vadd.f32 %v5966_v5, %v8952_v48  ;;  %v5503_v9 = vpop.f32.mrb[11].mxu0  ;;  %v5968_v10 = vpop.f32.mrb[11].mxu1 }
 0x1fe   : > { %v8066_v63 = vadd.f32 %v5503_v9, %v8958_v51  ;;  %v8068_v0 = vadd.f32 %v5968_v10, %v8960_v52 }
 0x1ff   : > { %vm5971_vm8 = vcmp.ge.f32.partialorder %v8065_v7, 0.0  ;;  %v5975_v11 = vmul.f32 0.2, %v8065_v7  ;;  %vm5973_vm9 = vcmp.ge.f32.partialorder %v8067_v8, 0.0  ;;  %v5977_v12 = vmul.f32 0.2, %v8067_v8 }
 0x200   : > { %vm5972_vm10 = vcmp.ge.f32.partialorder %v8066_v63, 0.0  ;;  %v5976_v13 = vmul.f32 0.2, %v8066_v63  ;;  %vm5974_vm11 = vcmp.ge.f32.partialorder %v8068_v0, 0.0  ;;  %v5978_v14 = vmul.f32 0.2, %v8068_v0 }
 0x201   : > { %v5979_v36 = vsel %vm5971_vm8, %v8065_v7, %v5975_v11  ;;  %v5981_v15 = vsel %vm5973_vm9, %v8067_v8, %v5977_v12 }
 0x202   : > { %8024 = vst [vmem:[%s8996_s26 + $0xa0] sm:$0xff] %v5979_v36  ;;  %8026 = vst [vmem:[%s8996_s26 + $0xb0] sm:$0xff] %v5981_v15  ;;  %v5980_v16 = vsel %vm5972_vm10, %v8066_v63, %v5976_v13  ;;  %v5982_v17 = vsel %vm5974_vm11, %v8068_v0, %v5978_v14 }
 0x203   : > { %8025 = vst [vmem:[%s8996_s26 + $0xa8] sm:$0xff] %v5980_v16  ;;  %8027 = vst.msk [vmem:[%s8996_s26 + $0xb8] sm:$0xff] %vm1156_vm2, %v5982_v17 }
 0x228   : > { %v6467_v18 = vpop.f32.mrb[12].mxu0  ;;  %v6932_v19 = vpop.f32.mrb[12].mxu1 }
 0x229   : > { %v8069_v20 = vadd.f32 %v6467_v18, %v8950_v47  ;;  %v8071_v21 = vadd.f32 %v6932_v19, %v8952_v48  ;;  %v6469_v62 = vpop.f32.mrb[13].mxu0  ;;  %v6934_v22 = vpop.f32.mrb[13].mxu1 }
 0x22a   : > { %v8070_v23 = vadd.f32 %v6469_v62, %v8958_v51  ;;  %v8072_v24 = vadd.f32 %v6934_v22, %v8960_v52 }
 0x22b   : > { %vm6937_vm12 = vcmp.ge.f32.partialorder %v8069_v20, 0.0  ;;  %v6941_v25 = vmul.f32 0.2, %v8069_v20  ;;  %vm6939_vm13 = vcmp.ge.f32.partialorder %v8071_v21, 0.0  ;;  %v6943_v26 = vmul.f32 0.2, %v8071_v21 }
 0x22c   : > { %vm6938_vm14 = vcmp.ge.f32.partialorder %v8070_v23, 0.0  ;;  %v6942_v27 = vmul.f32 0.2, %v8070_v23  ;;  %vm6940_vm15 = vcmp.ge.f32.partialorder %v8072_v24, 0.0  ;;  %v6944_v28 = vmul.f32 0.2, %v8072_v24 }
 0x22d   : > { %v6945_v29 = vsel %vm6937_vm12, %v8069_v20, %v6941_v25  ;;  %v6947_v30 = vsel %vm6939_vm13, %v8071_v21, %v6943_v26 }
 0x22e   : > { %8029 = vst [vmem:[%s8996_s26 + $0xc0] sm:$0xff] %v6945_v29  ;;  %8031 = vst [vmem:[%s8996_s26 + $0xd0] sm:$0xff] %v6947_v30  ;;  %v6946_v6 = vsel %vm6938_vm14, %v8070_v23, %v6942_v27  ;;  %v6948_v32 = vsel %vm6940_vm15, %v8072_v24, %v6944_v28 }
 0x22f   : > { %8030 = vst [vmem:[%s8996_s26 + $0xc8] sm:$0xff] %v6946_v6  ;;  %8032 = vst.msk [vmem:[%s8996_s26 + $0xd8] sm:$0xff] %vm1156_vm2, %v6948_v32 }
 0x254   : > { %v7433_v34 = vpop.f32.mrb[14].mxu0  ;;  %v7898_v37 = vpop.f32.mrb[14].mxu1 }
 0x255   : > { %v8073_v38 = vadd.f32 %v7433_v34, %v8950_v47  ;;  %v8075_v40 = vadd.f32 %v7898_v37, %v8952_v48  ;;  %v7435_v41 = vpop.f32.mrb[15].mxu0  ;;  %v7900_v35 = vpop.f32.mrb[15].mxu1 }
 0x256   : > { %v8074_v42 = vadd.f32 %v7435_v41, %v8958_v51  ;;  %v8076_v43 = vadd.f32 %v7900_v35, %v8960_v52 }
 0x257   : > { %vm7903_vm0 = vcmp.ge.f32.partialorder %v8073_v38, 0.0  ;;  %v7907_v45 = vmul.f32 0.2, %v8073_v38  ;;  %vm7905_vm1 = vcmp.ge.f32.partialorder %v8075_v40, 0.0  ;;  %v7909_v46 = vmul.f32 0.2, %v8075_v40 }
 0x258   : > { %vm7904_vm3 = vcmp.ge.f32.partialorder %v8074_v42, 0.0  ;;  %v7908_v47 = vmul.f32 0.2, %v8074_v42  ;;  %vm7906_vm4 = vcmp.ge.f32.partialorder %v8076_v43, 0.0  ;;  %v7910_v48 = vmul.f32 0.2, %v8076_v43 }
 0x259   : > { %v7911_v51 = vsel %vm7903_vm0, %v8073_v38, %v7907_v45  ;;  %v7913_v52 = vsel %vm7905_vm1, %v8075_v40, %v7909_v46 }
 0x25a   : > { %8034 = vst [vmem:[%s8996_s26 + $0xe0] sm:$0xff] %v7911_v51  ;;  %8036 = vst [vmem:[%s8996_s26 + $0xf0] sm:$0xff] %v7913_v52  ;;  %v7912_v49 = vsel %vm7904_vm3, %v8074_v42, %v7908_v47  ;;  %v7914_v50 = vsel %vm7906_vm4, %v8076_v43, %v7910_v48 }
 0x25b   : > { %8035 = vst [vmem:[%s8996_s26 + $0xe8] sm:$0xff] %v7912_v49  ;;  %8037 = vst.msk [vmem:[%s8996_s26 + $0xf8] sm:$0xff] %vm1156_vm2, %v7914_v50 }
 0x25c   : > { %8308 = shalt.err (!%p8305_p3)
}
 0x25d   : > { %s8309_s19 = scalar_lea.hbm %s9222_s7, 4096  ;;  %s8313_s25 = scalar_lea.hbm %s9277_s3, 8192 }
 0x25e   : > { %p8310_p4 = scmp.ne.s32.totalorder %s9222_s7, %s8309_s19  ;;  %p8314_p9 = scmp.lt.u32.totalorder %s9222_s7, %s9277_s3 }
 0x25f   : > { %p8315_p10 = scmp.lt.u32.totalorder %s8313_s25, %s8309_s19  ;;  %p8317_p12 = scmp.lt.u32.totalorder %s8309_s19, %s9222_s7 }
 0x260   : > { %p8311_p7 = pnand %p8310_p4, %p8421_p5 }
 0x261   : > { %p8316_p11 = por %p8315_p10, %p8314_p9 }
 0x262   : > { %p8312_p8 = pneg %p8311_p7 }
 0x263   : > { %p8318_p13 = por %p8317_p12, %p8316_p11 }
 0x265   : > { %p8319_p0 = pnand %p8318_p13, %p8312_p8 }
 0x267   : > { %8322 = shalt.err (!%p8319_p0)
}
 0x268   : > { %s8361_s28 = smov 512   ;;  %s8362_s29 = smov 32  }
 0x269   : > { %8237 = dma.vmem_to_hbm [thread:$0]  (%p8421_p5), %s9224_s4, 4096, %s9222_s7, %s9233_s8, %s8361_s28, %s8361_s28, %s8362_s29  }
 0x26a PF: > { %p8243_p1 = scmp.ge.s32.totalorder %s8357_s15, 2  ;;  %s7949_s30 = sand.u32 1, %s8345_s12  }
 0x26b   : > { %s7950_s5 = scalar_lea.sflag [#allocation3], %s7949_s30 }
 0x26c   : > { %p8240_p2 = pnand %p8243_p1, %p8425_p6 }
 0x26e   : > { %8340 = dma.done.wait (!%p8240_p2), %s7950_s5, 4096  }
 0x26f   : > { %8342 = vsyncadd (!%p8240_p2), %s7950_s5, 4294963200  ;;  %p13_p3 = scmp.ge.s32.totalorder %s8408_s18, 4   ;;  %s9280_s12 = smov %s8349_s13 }
 0x270   : > { %s9281_s13 = smov %s8353_s14  ;;  %s9282_s14 = smov %s8419_s21 }
 0x271   : > { %s9283_s15 = smov %s8408_s18  ;;  %15 = sbr.rel (!%p13_p3) target bundleno = 3 (0x3), region = 81 }
 0x278   :  { %7955 = vsyncpa [#allocation3], 1 }
 0x279   :  { %7957 = vsyncpa [#allocation3 + $0x1], 1 }

</bundles_post_ra>
